<compile_context>
chip_gen: v5e
topology: v5e:2x2
jax: 0.10.0
libtpu: 0.0.40
codegen_flags: <defaults>
</compile_context>

<pallas_src>
import functools

import jax
import jax.numpy as jnp
from jax import lax
from jax.experimental import pallas as pl
from jax.experimental.pallas import tpu as pltpu

_VMEM_LIMIT = 48 * 1024 * 1024


def _round_up(v, m):
    return ((v + m - 1) // m) * m


# ---------------------------------------------------------------------------
# Wrapper-side layout helpers (cheap XLA data movement only)
# ---------------------------------------------------------------------------
def _weight_mat(w_torch, cin_pad):
    """PyTorch (Cout, Cin, 3, 3) -> (Cout, 9*Cin_pad); K order (dy*3+dx)*Cin_pad + ci."""
    cin = w_torch.shape[1]
    wp = jnp.pad(w_torch, ((0, 0), (0, cin_pad - cin), (0, 0), (0, 0)))
    return jnp.transpose(wp, (0, 2, 3, 1)).reshape(w_torch.shape[0], 9 * cin_pad)


def _pixel_shuffle_cf(x, r):
    """PixelShuffle(r) on NCHW: (N, C*r*r, H, W) -> (N, C, H*r, W*r)."""
    n, cr2, h, w = x.shape
    c = cr2 // (r * r)
    x = x.reshape(n, c, r, r, h, w)
    x = jnp.transpose(x, (0, 1, 4, 2, 5, 3))
    return x.reshape(n, c, h * r, w * r)


def _row_windows(x_flat, w_row, tile, c_pad):
    """(N, C, L) -> ((N, n_t, C_pad, tile + 2*(w_row+1)), n_t).

    Overlapping haloed windows of the zero-padded flat image so every 3x3 tap
    of every output position of tile j lies inside window j (top/bottom image
    rows read the zero padding; column wrap-around is masked in-kernel)."""
    n, c, l = x_flat.shape
    n_t = pl.cdiv(l, tile)
    halo = w_row + 1
    xp = jnp.pad(x_flat, ((0, 0), (0, c_pad - c),
                          (halo, n_t * tile - l + halo)))
    wlen = tile + 2 * halo
    wins = jnp.stack([xp[:, :, j * tile:j * tile + wlen] for j in range(n_t)],
                     axis=1)
    return wins, n_t


# ---------------------------------------------------------------------------
# In-kernel helpers / kernels
# ---------------------------------------------------------------------------
def _conv3x3_from_window(win_ref, w_mat, bias, col, *, w_row, tile):
    """3x3 'same' conv of one haloed window as ONE (Cout, K) @ (K, tile) matmul.

    win_ref : (1, 1, Cin_pad, tile + 2*(w_row+1)) block ref (flat HW on lanes)
    col     : (1, tile) int32 = global flat index % w_row (column-border masks)
    """
    not_left = col > 0
    not_right = col < (w_row - 1)
    slabs = []
    for dy in range(3):                 # tap (dy-1, dx-1); window origin = -(w_row+1)
        for dx in range(3):
            s = dy * w_row + dx
            slab = win_ref[0, 0, :, s:s + tile]          # (Cin_pad, tile)
            if dx == 0:
                slab = jnp.where(not_left, slab, 0.0)
            elif dx == 2:
                slab = jnp.where(not_right, slab, 0.0)
            slabs.append(slab)
    taps = jnp.concatenate(slabs, axis=0)                # (9*Cin_pad, tile)
    return jnp.dot(w_mat, taps, preferred_element_type=jnp.float32) + bias


def _up_kernel(win_ref, w_ref, b_ref, o_ref, *, c_sup, w_row, tile):
    j = pl.program_id(1)
    col = (lax.broadcasted_iota(jnp.int32, (1, tile), 1) + j * tile) % w_row
    acc = _conv3x3_from_window(win_ref, w_ref[...], b_ref[...], col,
                               w_row=w_row, tile=tile)            # (Ctot, tile)
    # LeakyReLU(0.01) on the sup_conv rows only: static sublane-aligned split.
    sup = acc[:c_sup]
    o_ref[0, :c_sup] = jnp.where(sup >= 0.0, sup, 0.01 * sup).astype(o_ref.dtype)
    o_ref[0, c_sup:] = acc[c_sup:].astype(o_ref.dtype)


def _core_conv_gdn_pool_kernel(win_ref, w_ref, b_ref, g_ref, beta_ref,
                               xg_ref, pool_ref, *, w_row, tile, hw_valid):
    j = pl.program_id(1)
    lane = lax.broadcasted_iota(jnp.int32, (1, tile), 1) + j * tile
    x = _conv3x3_from_window(win_ref, w_ref[...], b_ref[...], lane % w_row,
                             w_row=w_row, tile=tile)              # (C, tile)
    # inverse GDN: x * sqrt(gamma @ x^2 + beta)
    norm = jnp.dot(g_ref[...], x * x,
                   preferred_element_type=jnp.float32) + beta_ref[...]
    xg = x * jnp.sqrt(norm)
    xg_ref[0] = xg.astype(xg_ref.dtype)
    # Exact full-image ECA pool: per-channel partial sums across the HW tile
    # ("arbitrary") axis; tail padding masked out of the reduction.
    part = jnp.sum(jnp.where(lane < hw_valid, xg, 0.0), axis=1, keepdims=True)

    @pl.when(j == 0)
    def _init():
        pool_ref[0] = jnp.zeros_like(part)

    pool_ref[0] += part


def _gate_residual_kernel(xg_ref, pool_ref, band_ref, id_ref, o_ref, *, inv_hw):
    # ECA: k=3 channel conv (banded CxC matrix) on the pooled mean, sigmoid
    # gate, channel gate + residual add with the identity branch.
    gate = jax.nn.sigmoid(jnp.dot(band_ref[...], pool_ref[0] * inv_hw,
                                  preferred_element_type=jnp.float32))  # (C,1)
    o_ref[0] = (xg_ref[0] * gate + id_ref[0]).astype(o_ref.dtype)


# ---------------------------------------------------------------------------
# pallas_call wrappers
# ---------------------------------------------------------------------------
def fused_up_convs(x_nchw, w_sup, b_sup, w_id, b_id, *, lane_tile=1024):
    """sup_conv + identity_up in one HW-tiled pallas_call (in-kernel im2col).

    Returns (N, 8*out_c, H, W); rows [:4*out_c] already have LeakyReLU applied
    (it commutes with the PixelShuffle applied by the caller)."""
    n, cin, h, w = x_nchw.shape
    hw = h * w
    c_sup = w_sup.shape[0]
    c_tot = c_sup + w_id.shape[0]
    cin_pad = _round_up(cin, 8)

    tile = min(lane_tile, _round_up(hw, 128))            # multiple of 128
    wins, n_t = _row_windows(x_nchw.reshape(n, cin, hw), w, tile, cin_pad)
    wlen = wins.shape[-1]

    w_cat = jnp.concatenate([_weight_mat(w_sup, cin_pad),
                             _weight_mat(w_id, cin_pad)], axis=0)
    b_cat = jnp.concatenate([b_sup, b_id]).reshape(c_tot, 1)

    kern = functools.partial(_up_kernel, c_sup=c_sup, w_row=w, tile=tile)
    out = pl.pallas_call(
        kern,
        out_shape=jax.ShapeDtypeStruct((n, c_tot, n_t * tile), jnp.float32),
        grid=(n, n_t),
        in_specs=[
            pl.BlockSpec((1, 1, cin_pad, wlen), lambda i, j: (i, j, 0, 0)),
            pl.BlockSpec((c_tot, 9 * cin_pad), lambda i, j: (0, 0)),
            pl.BlockSpec((c_tot, 1), lambda i, j: (0, 0)),
        ],
        out_specs=pl.BlockSpec((1, c_tot, tile), lambda i, j: (i, 0, j)),
        compiler_params=pltpu.CompilerParams(
            dimension_semantics=("parallel", "parallel"),
            vmem_limit_bytes=_VMEM_LIMIT),
    )(wins, w_cat, b_cat)
    return out[:, :, :hw].reshape(n, c_tot, h, w)


def fused_conv_igdn_eca_add(main_cf, ident_cf, w_c1, b_c1, gamma, beta, w_eca,
                            *, lane_tile=512):
    """conv_1 + iGDN + exact ECA pool (pass 1), then gate + residual (pass 2)."""
    n, c, h, w = main_cf.shape
    hw = h * w
    cin_pad = _round_up(c, 8)
    tile = min(lane_tile, _round_up(hw, 128))
    wins, n_t = _row_windows(main_cf.reshape(n, c, hw), w, tile, cin_pad)
    wlen = wins.shape[-1]
    hwp = n_t * tile

    wmat = _weight_mat(w_c1, cin_pad)                    # (C, 9*Cin_pad)
    # ECA Conv1d(1,1,k=3,pad=1,bias=False) over channels as a banded CxC matrix.
    band = (jnp.diag(jnp.full((c - 1,), w_eca[0]), k=-1)
            + jnp.diag(jnp.full((c,), w_eca[1]), k=0)
            + jnp.diag(jnp.full((c - 1,), w_eca[2]), k=1))
    ident_flat = jnp.pad(ident_cf.reshape(n, c, hw),
                         ((0, 0), (0, 0), (0, hwp - hw)))

    kern1 = functools.partial(_core_conv_gdn_pool_kernel,
                              w_row=w, tile=tile, hw_valid=hw)
    x_gdn, pooled = pl.pallas_call(
        kern1,
        out_shape=(jax.ShapeDtypeStruct((n, c, hwp), jnp.float32),
                   jax.ShapeDtypeStruct((n, c, 1), jnp.float32)),
        grid=(n, n_t),
        in_specs=[
            pl.BlockSpec((1, 1, cin_pad, wlen), lambda i, j: (i, j, 0, 0)),
            pl.BlockSpec((c, 9 * cin_pad), lambda i, j: (0, 0)),
            pl.BlockSpec((c, 1), lambda i, j: (0, 0)),
            pl.BlockSpec((c, c), lambda i, j: (0, 0)),
            pl.BlockSpec((c, 1), lambda i, j: (0, 0)),
        ],
        out_specs=(pl.BlockSpec((1, c, tile), lambda i, j: (i, 0, j)),
                   pl.BlockSpec((1, c, 1), lambda i, j: (i, 0, 0))),
        compiler_params=pltpu.CompilerParams(
            dimension_semantics=("parallel", "arbitrary"),
            vmem_limit_bytes=_VMEM_LIMIT),
    )(wins, wmat, b_c1.reshape(c, 1), gamma, beta.reshape(c, 1))

    kern2 = functools.partial(_gate_residual_kernel, inv_hw=1.0 / hw)
    out = pl.pallas_call(
        kern2,
        out_shape=jax.ShapeDtypeStruct((n, c, hwp), jnp.float32),
        grid=(n, n_t),
        in_specs=[
            pl.BlockSpec((1, c, tile), lambda i, j: (i, 0, j)),
            pl.BlockSpec((1, c, 1), lambda i, j: (i, 0, 0)),
            pl.BlockSpec((c, c), lambda i, j: (0, 0)),
            pl.BlockSpec((1, c, tile), lambda i, j: (i, 0, j)),
        ],
        out_specs=pl.BlockSpec((1, c, tile), lambda i, j: (i, 0, j)),
        compiler_params=pltpu.CompilerParams(
            dimension_semantics=("parallel", "parallel"),
            vmem_limit_bytes=_VMEM_LIMIT),
    )(x_gdn, pooled, band, ident_flat)
    return out[:, :, :hw].reshape(n, c, h, w)


# ---------------------------------------------------------------------------
# Full module forward (NCHW in, NCHW out)
# ---------------------------------------------------------------------------
def res_block_up(x_nchw, p):
    c_sup = p["w_sup"].shape[0]                          # 4 * out_c
    up = fused_up_convs(x_nchw, p["w_sup"], p["b_sup"], p["w_id"], p["b_id"])
    main = _pixel_shuffle_cf(up[:, :c_sup], 2)           # sup branch (+leaky)
    ident = _pixel_shuffle_cf(up[:, c_sup:], 2)          # identity branch
    return fused_conv_igdn_eca_add(main, ident, p["w_c1"], p["b_c1"],
                                   p["gamma"], p["beta"], p["w_eca"])


# ---------------------------------------------------------------------------
# Pure-JAX reference (numerical sanity check)
# ---------------------------------------------------------------------------
def _pixel_shuffle_nhwc(x, r):
    n, h, w, cr2 = x.shape
    c = cr2 // (r * r)
    x = x.reshape(n, h, w, c, r, r)
    x = jnp.transpose(x, (0, 1, 4, 2, 5, 3))
    return x.reshape(n, h * r, w * r, c)


def _conv_ref(x_nhwc, w_torch, b):
    return lax.conv_general_dilated(
        x_nhwc, jnp.transpose(w_torch, (2, 3, 1, 0)), (1, 1), "SAME",
        dimension_numbers=("NHWC", "HWIO", "NHWC")) + b


def res_block_up_ref(x_nchw, p):
    x = jnp.transpose(x_nchw, (0, 2, 3, 1))
    out = _conv_ref(x, p["w_sup"], p["b_sup"])
    out = _pixel_shuffle_nhwc(out, 2)
    out = jnp.where(out >= 0, out, 0.01 * out)
    out = _conv_ref(out, p["w_c1"], p["b_c1"])
    out = out * jnp.sqrt(jnp.einsum("nhwc,kc->nhwk", out * out, p["gamma"]) + p["beta"])
    y = jnp.mean(out, axis=(1, 2))                        # (N, C)
    yp = jnp.pad(y, ((0, 0), (1, 1)))
    yc = (p["w_eca"][0] * yp[:, :-2] + p["w_eca"][1] * yp[:, 1:-1]
          + p["w_eca"][2] * yp[:, 2:])
    out = out * jax.nn.sigmoid(yc)[:, None, None, :]
    identity = _pixel_shuffle_nhwc(_conv_ref(x, p["w_id"], p["b_id"]), 2)
    return jnp.transpose(out + identity, (0, 3, 1, 2))


# ---------------------------------------------------------------------------
if __name__ == "__main__":
    in_c, out_c = 4, 4
    N, H, W = 2, 16, 16

    key = jax.random.PRNGKey(0)
    ks = jax.random.split(key, 10)
    params = {
        # subpel_conv3x3(in_c, out_c, r=2): Conv2d(in_c, out_c*4, 3, pad=1)
        "w_sup": 0.1 * jax.random.normal(ks[0], (out_c * 4, in_c, 3, 3), jnp.float32),
        "b_sup": 0.01 * jax.random.normal(ks[1], (out_c * 4,), jnp.float32),
        # conv_1: Conv2d(out_c, out_c, 3, pad=1)
        "w_c1": 0.1 * jax.random.normal(ks[2], (out_c, out_c, 3, 3), jnp.float32),
        "b_c1": 0.01 * jax.random.normal(ks[3], (out_c,), jnp.float32),
        # GDN(inverse=True) effective (re-parametrized) params, non-negative
        "gamma": 0.1 * jnp.eye(out_c, dtype=jnp.float32)
                 + 0.001 * jnp.abs(jax.random.normal(ks[4], (out_c, out_c), jnp.float32)),
        "beta": jnp.ones((out_c,), jnp.float32)
                + 0.05 * jnp.abs(jax.random.normal(ks[5], (out_c,), jnp.float32)),
        # ECA Conv1d(1, 1, k=3, bias=False) weight
        "w_eca": 0.5 * jax.random.normal(ks[6], (3,), jnp.float32),
        # identity_up: Conv2d(in_c, out_c*4, 3, pad=1)
        "w_id": 0.1 * jax.random.normal(ks[7], (out_c * 4, in_c, 3, 3), jnp.float32),
        "b_id": 0.01 * jax.random.normal(ks[8], (out_c * 4,), jnp.float32),
    }

    x = jax.random.normal(ks[9], (N, in_c, H, W), jnp.float32)

    out = jax.block_until_ready(jax.jit(res_block_up)(x, params))
    ref = jax.block_until_ready(res_block_up_ref(x, params))

    assert out.shape == (N, out_c, 2 * H, 2 * W), out.shape
    max_err = float(jnp.max(jnp.abs(out - ref)))
    assert jnp.allclose(out, ref, rtol=1e-4, atol=1e-4), max_err
    print("KERNEL_OK")
</pallas_src>

<mosaic_0001>
module attributes {stable_mosaic.version = 11 : i64} {
  func.func @_up_kernel(%arg0: i32, %arg1: i32, %arg2: memref<1x1x8x290xf32, #tpu.memory_space<vmem>>, %arg3: memref<32x72xf32, #tpu.memory_space<vmem>>, %arg4: memref<32x1xf32, #tpu.memory_space<vmem>>, %arg5: memref<1x32x256xf32, #tpu.memory_space<vmem>>) attributes {dimension_semantics = [#tpu.dimension_semantics<parallel>, #tpu.dimension_semantics<parallel>], iteration_bounds = array<i64: 2, 1>, scalar_prefetch = 0 : i64, scratch_operands = 0 : i64, tpu.core_type = #tpu.core_type<tc>, window_params = [{transform_indices = @transform_0, window_bounds = array<i64: 1, 1, 8, 290>}, {pipeline_mode = #tpu.pipeline_mode<synchronous>, transform_indices = @transform_1, window_bounds = array<i64: 32, 72>}, {pipeline_mode = #tpu.pipeline_mode<synchronous>, transform_indices = @transform_2, window_bounds = array<i64: 32, 1>}, {transform_indices = @transform_3, window_bounds = array<i64: 1, 32, 256>}]} {
    %0 = tpu.iota {dimensions = array<i32: 1>} : vector<1x256xi32>
    %c256_i32 = arith.constant 256 : i32
    %1 = arith.muli %arg1, %c256_i32 : i32
    %2 = vector.broadcast %1 : i32 to vector<1x256xi32>
    %3 = arith.addi %0, %2 : vector<1x256xi32>
    %c16_i32 = arith.constant 16 : i32
    %c0_i32 = arith.constant 0 : i32
    %4 = arith.cmpi eq, %c16_i32, %c0_i32 : i32
    %c1_i32 = arith.constant 1 : i32
    %5 = arith.select %4, %c1_i32, %c16_i32 : i32
    %6 = vector.broadcast %5 : i32 to vector<1x256xi32>
    %7 = arith.remsi %3, %6 : vector<1x256xi32>
    %c0_i32_0 = arith.constant 0 : i32
    %8 = vector.broadcast %c0_i32_0 : i32 to vector<1x256xi32>
    %9 = arith.cmpi ne, %7, %8 : vector<1x256xi32>
    %c0_i32_1 = arith.constant 0 : i32
    %10 = vector.broadcast %c0_i32_1 : i32 to vector<1x256xi32>
    %11 = arith.cmpi slt, %7, %10 : vector<1x256xi32>
    %c0_i32_2 = arith.constant 0 : i32
    %12 = arith.cmpi slt, %5, %c0_i32_2 : i32
    %13 = vector.broadcast %12 : i1 to vector<1x256xi1>
    %14 = vector.broadcast %13 : vector<1x256xi1> to vector<1x256xi1>
    %15 = arith.xori %11, %14 : vector<1x256xi1>
    %16 = arith.andi %15, %9 : vector<1x256xi1>
    %17 = vector.broadcast %5 : i32 to vector<1x256xi32>
    %18 = arith.addi %7, %17 : vector<1x256xi32>
    %19 = arith.select %16, %18, %7 : vector<1x256xi1>, vector<1x256xi32>
    %c0 = arith.constant 0 : index
    %c0_3 = arith.constant 0 : index
    %20 = vector.load %arg3[%c0, %c0_3] : memref<32x72xf32, #tpu.memory_space<vmem>>, vector<32x72xf32>
    %c0_4 = arith.constant 0 : index
    %c0_5 = arith.constant 0 : index
    %21 = vector.load %arg4[%c0_4, %c0_5] : memref<32x1xf32, #tpu.memory_space<vmem>>, vector<32x1xf32>
    %c0_i32_6 = arith.constant 0 : i32
    %22 = vector.broadcast %c0_i32_6 : i32 to vector<1x256xi32>
    %23 = arith.cmpi sgt, %19, %22 : vector<1x256xi32>
    %c15_i32 = arith.constant 15 : i32
    %24 = vector.broadcast %c15_i32 : i32 to vector<1x256xi32>
    %25 = arith.cmpi slt, %19, %24 : vector<1x256xi32>
    %c0_7 = arith.constant 0 : index
    %c0_8 = arith.constant 0 : index
    %c0_9 = arith.constant 0 : index
    %c0_10 = arith.constant 0 : index
    %26 = vector.load %arg2[%c0_7, %c0_8, %c0_9, %c0_10] : memref<1x1x8x290xf32, #tpu.memory_space<vmem>>, vector<1x1x8x256xf32>
    %27 = vector.shape_cast %26 : vector<1x1x8x256xf32> to vector<8x256xf32>
    %cst = arith.constant 0.000000e+00 : f32
    %28 = vector.shape_cast %23 : vector<1x256xi1> to vector<1x256xi1>
    %29 = vector.broadcast %28 : vector<1x256xi1> to vector<8x256xi1>
    %30 = vector.broadcast %cst : f32 to vector<8x256xf32>
    %31 = arith.select %29, %27, %30 : vector<8x256xi1>, vector<8x256xf32>
    %c0_11 = arith.constant 0 : index
    %c0_12 = arith.constant 0 : index
    %c0_13 = arith.constant 0 : index
    %c1 = arith.constant 1 : index
    %32 = vector.load %arg2[%c0_11, %c0_12, %c0_13, %c1] : memref<1x1x8x290xf32, #tpu.memory_space<vmem>>, vector<1x1x8x256xf32>
    %33 = vector.shape_cast %32 : vector<1x1x8x256xf32> to vector<8x256xf32>
    %c0_14 = arith.constant 0 : index
    %c0_15 = arith.constant 0 : index
    %c0_16 = arith.constant 0 : index
    %c2 = arith.constant 2 : index
    %34 = vector.load %arg2[%c0_14, %c0_15, %c0_16, %c2] : memref<1x1x8x290xf32, #tpu.memory_space<vmem>>, vector<1x1x8x256xf32>
    %35 = vector.shape_cast %34 : vector<1x1x8x256xf32> to vector<8x256xf32>
    %cst_17 = arith.constant 0.000000e+00 : f32
    %36 = vector.shape_cast %25 : vector<1x256xi1> to vector<1x256xi1>
    %37 = vector.broadcast %36 : vector<1x256xi1> to vector<8x256xi1>
    %38 = vector.broadcast %cst_17 : f32 to vector<8x256xf32>
    %39 = arith.select %37, %35, %38 : vector<8x256xi1>, vector<8x256xf32>
    %c0_18 = arith.constant 0 : index
    %c0_19 = arith.constant 0 : index
    %c0_20 = arith.constant 0 : index
    %c16 = arith.constant 16 : index
    %40 = vector.load %arg2[%c0_18, %c0_19, %c0_20, %c16] : memref<1x1x8x290xf32, #tpu.memory_space<vmem>>, vector<1x1x8x256xf32>
    %41 = vector.shape_cast %40 : vector<1x1x8x256xf32> to vector<8x256xf32>
    %cst_21 = arith.constant 0.000000e+00 : f32
    %42 = vector.shape_cast %23 : vector<1x256xi1> to vector<1x256xi1>
    %43 = vector.broadcast %42 : vector<1x256xi1> to vector<8x256xi1>
    %44 = vector.broadcast %cst_21 : f32 to vector<8x256xf32>
    %45 = arith.select %43, %41, %44 : vector<8x256xi1>, vector<8x256xf32>
    %c0_22 = arith.constant 0 : index
    %c0_23 = arith.constant 0 : index
    %c0_24 = arith.constant 0 : index
    %c17 = arith.constant 17 : index
    %46 = vector.load %arg2[%c0_22, %c0_23, %c0_24, %c17] : memref<1x1x8x290xf32, #tpu.memory_space<vmem>>, vector<1x1x8x256xf32>
    %47 = vector.shape_cast %46 : vector<1x1x8x256xf32> to vector<8x256xf32>
    %c0_25 = arith.constant 0 : index
    %c0_26 = arith.constant 0 : index
    %c0_27 = arith.constant 0 : index
    %c18 = arith.constant 18 : index
    %48 = vector.load %arg2[%c0_25, %c0_26, %c0_27, %c18] : memref<1x1x8x290xf32, #tpu.memory_space<vmem>>, vector<1x1x8x256xf32>
    %49 = vector.shape_cast %48 : vector<1x1x8x256xf32> to vector<8x256xf32>
    %cst_28 = arith.constant 0.000000e+00 : f32
    %50 = vector.shape_cast %25 : vector<1x256xi1> to vector<1x256xi1>
    %51 = vector.broadcast %50 : vector<1x256xi1> to vector<8x256xi1>
    %52 = vector.broadcast %cst_28 : f32 to vector<8x256xf32>
    %53 = arith.select %51, %49, %52 : vector<8x256xi1>, vector<8x256xf32>
    %c0_29 = arith.constant 0 : index
    %c0_30 = arith.constant 0 : index
    %c0_31 = arith.constant 0 : index
    %c32 = arith.constant 32 : index
    %54 = vector.load %arg2[%c0_29, %c0_30, %c0_31, %c32] : memref<1x1x8x290xf32, #tpu.memory_space<vmem>>, vector<1x1x8x256xf32>
    %55 = vector.shape_cast %54 : vector<1x1x8x256xf32> to vector<8x256xf32>
    %cst_32 = arith.constant 0.000000e+00 : f32
    %56 = vector.shape_cast %23 : vector<1x256xi1> to vector<1x256xi1>
    %57 = vector.broadcast %56 : vector<1x256xi1> to vector<8x256xi1>
    %58 = vector.broadcast %cst_32 : f32 to vector<8x256xf32>
    %59 = arith.select %57, %55, %58 : vector<8x256xi1>, vector<8x256xf32>
    %c0_33 = arith.constant 0 : index
    %c0_34 = arith.constant 0 : index
    %c0_35 = arith.constant 0 : index
    %c33 = arith.constant 33 : index
    %60 = vector.load %arg2[%c0_33, %c0_34, %c0_35, %c33] : memref<1x1x8x290xf32, #tpu.memory_space<vmem>>, vector<1x1x8x256xf32>
    %61 = vector.shape_cast %60 : vector<1x1x8x256xf32> to vector<8x256xf32>
    %c0_36 = arith.constant 0 : index
    %c0_37 = arith.constant 0 : index
    %c0_38 = arith.constant 0 : index
    %c34 = arith.constant 34 : index
    %62 = vector.load %arg2[%c0_36, %c0_37, %c0_38, %c34] : memref<1x1x8x290xf32, #tpu.memory_space<vmem>>, vector<1x1x8x256xf32>
    %63 = vector.shape_cast %62 : vector<1x1x8x256xf32> to vector<8x256xf32>
    %cst_39 = arith.constant 0.000000e+00 : f32
    %64 = vector.shape_cast %25 : vector<1x256xi1> to vector<1x256xi1>
    %65 = vector.broadcast %64 : vector<1x256xi1> to vector<8x256xi1>
    %66 = vector.broadcast %cst_39 : f32 to vector<8x256xf32>
    %67 = arith.select %65, %63, %66 : vector<8x256xi1>, vector<8x256xf32>
    %68 = tpu.concatenate %31, %33, %39, %45, %47, %53, %59, %61, %67 in 0 : vector<8x256xf32>, vector<8x256xf32>, vector<8x256xf32>, vector<8x256xf32>, vector<8x256xf32>, vector<8x256xf32>, vector<8x256xf32>, vector<8x256xf32>, vector<8x256xf32> -> vector<72x256xf32>
    %cst_40 = arith.constant dense<0.000000e+00> : vector<32x256xf32>
    %69 = tpu.matmul %20, %68, %cst_40 {dimension_numbers = #tpu.dot_dimension_numbers<[1], [0], [0], [1], [0, 0, 1, 1], [], []>} : vector<32x72xf32>, vector<72x256xf32>, vector<32x256xf32> -> vector<32x256xf32>
    %70 = vector.broadcast %21 : vector<32x1xf32> to vector<32x256xf32>
    %71 = arith.addf %69, %70 : vector<32x256xf32>
    %72 = vector.extract_strided_slice %71 {offsets = [0, 0], sizes = [16, 256], strides = [1, 1]} : vector<32x256xf32> to vector<16x256xf32>
    %cst_41 = arith.constant 0.000000e+00 : f32
    %73 = vector.broadcast %cst_41 : f32 to vector<16x256xf32>
    %74 = arith.cmpf oge, %72, %73 : vector<16x256xf32>
    %cst_42 = arith.constant 0.00999999977 : f32
    %75 = vector.broadcast %cst_42 : f32 to vector<16x256xf32>
    %76 = arith.mulf %75, %72 : vector<16x256xf32>
    %77 = arith.select %74, %72, %76 : vector<16x256xi1>, vector<16x256xf32>
    %c0_43 = arith.constant 0 : index
    %c0_44 = arith.constant 0 : index
    %c0_45 = arith.constant 0 : index
    %78 = vector.load %arg5[%c0_43, %c0_44, %c0_45] : memref<1x32x256xf32, #tpu.memory_space<vmem>>, vector<1x16x256xf32>
    %79 = vector.shape_cast %78 : vector<1x16x256xf32> to vector<16x256xf32>
    %80 = vector.shape_cast %77 : vector<16x256xf32> to vector<1x16x256xf32>
    tpu.vector_store %arg5[%c0_43, %c0_44, %c0_45], %80 {strides = array<i32>} : memref<1x32x256xf32, #tpu.memory_space<vmem>>, vector<1x16x256xf32>,
    %81 = vector.extract_strided_slice %71 {offsets = [16, 0], sizes = [16, 256], strides = [1, 1]} : vector<32x256xf32> to vector<16x256xf32>
    %c0_46 = arith.constant 0 : index
    %c16_47 = arith.constant 16 : index
    %c0_48 = arith.constant 0 : index
    %82 = vector.load %arg5[%c0_46, %c16_47, %c0_48] : memref<1x32x256xf32, #tpu.memory_space<vmem>>, vector<1x16x256xf32>
    %83 = vector.shape_cast %82 : vector<1x16x256xf32> to vector<16x256xf32>
    %84 = vector.shape_cast %81 : vector<16x256xf32> to vector<1x16x256xf32>
    tpu.vector_store %arg5[%c0_46, %c16_47, %c0_48], %84 {strides = array<i32>} : memref<1x32x256xf32, #tpu.memory_space<vmem>>, vector<1x16x256xf32>,
    return
  }
  func.func @transform_0(%arg0: i32, %arg1: i32) -> (i32, i32, i32, i32) {
    %c0_i32 = arith.constant 0 : i32
    %c0_i32_0 = arith.constant 0 : i32
    %c0_i32_1 = arith.constant 0 : i32
    return %arg0, %arg1, %c0_i32, %c0_i32_0 : i32, i32, i32, i32
  }
  func.func @transform_1(%arg0: i32, %arg1: i32) -> (i32, i32) {
    %c0_i32 = arith.constant 0 : i32
    %c0_i32_0 = arith.constant 0 : i32
    %c0_i32_1 = arith.constant 0 : i32
    return %c0_i32, %c0_i32_0 : i32, i32
  }
  func.func @transform_2(%arg0: i32, %arg1: i32) -> (i32, i32) {
    %c0_i32 = arith.constant 0 : i32
    %c0_i32_0 = arith.constant 0 : i32
    %c0_i32_1 = arith.constant 0 : i32
    return %c0_i32, %c0_i32_0 : i32, i32
  }
  func.func @transform_3(%arg0: i32, %arg1: i32) -> (i32, i32, i32) {
    %c0_i32 = arith.constant 0 : i32
    %c0_i32_0 = arith.constant 0 : i32
    return %arg0, %c0_i32, %arg1 : i32, i32, i32
  }
}

module attributes {stable_mosaic.version = 11 : i64} {
  func.func @_core_conv_gdn_pool_kernel(%arg0: i32, %arg1: i32, %arg2: memref<1x1x8x578xf32, #tpu.memory_space<vmem>>, %arg3: memref<4x72xf32, #tpu.memory_space<vmem>>, %arg4: memref<4x1xf32, #tpu.memory_space<vmem>>, %arg5: memref<4x4xf32, #tpu.memory_space<vmem>>, %arg6: memref<4x1xf32, #tpu.memory_space<vmem>>, %arg7: memref<1x4x512xf32, #tpu.memory_space<vmem>>, %arg8: memref<1x4x1xf32, #tpu.memory_space<vmem>>) attributes {dimension_semantics = [#tpu.dimension_semantics<parallel>, #tpu.dimension_semantics<arbitrary>], iteration_bounds = array<i64: 2, 2>, scalar_prefetch = 0 : i64, scratch_operands = 0 : i64, tpu.core_type = #tpu.core_type<tc>, window_params = [{transform_indices = @transform_0, window_bounds = array<i64: 1, 1, 8, 578>}, {pipeline_mode = #tpu.pipeline_mode<synchronous>, transform_indices = @transform_1, window_bounds = array<i64: 4, 72>}, {pipeline_mode = #tpu.pipeline_mode<synchronous>, transform_indices = @transform_2, window_bounds = array<i64: 4, 1>}, {pipeline_mode = #tpu.pipeline_mode<synchronous>, transform_indices = @transform_3, window_bounds = array<i64: 4, 4>}, {pipeline_mode = #tpu.pipeline_mode<synchronous>, transform_indices = @transform_4, window_bounds = array<i64: 4, 1>}, {transform_indices = @transform_5, window_bounds = array<i64: 1, 4, 512>}, {transform_indices = @transform_6, window_bounds = array<i64: 1, 4, 1>}]} {
    %0 = tpu.iota {dimensions = array<i32: 1>} : vector<1x512xi32>
    %c512_i32 = arith.constant 512 : i32
    %1 = arith.muli %arg1, %c512_i32 : i32
    %2 = vector.broadcast %1 : i32 to vector<1x512xi32>
    %3 = arith.addi %0, %2 : vector<1x512xi32>
    %c0 = arith.constant 0 : index
    %c0_0 = arith.constant 0 : index
    %4 = vector.load %arg3[%c0, %c0_0] : memref<4x72xf32, #tpu.memory_space<vmem>>, vector<4x72xf32>
    %c0_1 = arith.constant 0 : index
    %c0_2 = arith.constant 0 : index
    %5 = vector.load %arg4[%c0_1, %c0_2] : memref<4x1xf32, #tpu.memory_space<vmem>>, vector<4x1xf32>
    %c32_i32 = arith.constant 32 : i32
    %c0_i32 = arith.constant 0 : i32
    %6 = arith.cmpi eq, %c32_i32, %c0_i32 : i32
    %c1_i32 = arith.constant 1 : i32
    %7 = arith.select %6, %c1_i32, %c32_i32 : i32
    %8 = vector.broadcast %7 : i32 to vector<1x512xi32>
    %9 = arith.remsi %3, %8 : vector<1x512xi32>
    %c0_i32_3 = arith.constant 0 : i32
    %10 = vector.broadcast %c0_i32_3 : i32 to vector<1x512xi32>
    %11 = arith.cmpi ne, %9, %10 : vector<1x512xi32>
    %c0_i32_4 = arith.constant 0 : i32
    %12 = vector.broadcast %c0_i32_4 : i32 to vector<1x512xi32>
    %13 = arith.cmpi slt, %9, %12 : vector<1x512xi32>
    %c0_i32_5 = arith.constant 0 : i32
    %14 = arith.cmpi slt, %7, %c0_i32_5 : i32
    %15 = vector.broadcast %14 : i1 to vector<1x512xi1>
    %16 = vector.broadcast %15 : vector<1x512xi1> to vector<1x512xi1>
    %17 = arith.xori %13, %16 : vector<1x512xi1>
    %18 = arith.andi %17, %11 : vector<1x512xi1>
    %19 = vector.broadcast %7 : i32 to vector<1x512xi32>
    %20 = arith.addi %9, %19 : vector<1x512xi32>
    %21 = arith.select %18, %20, %9 : vector<1x512xi1>, vector<1x512xi32>
    %c0_i32_6 = arith.constant 0 : i32
    %22 = vector.broadcast %c0_i32_6 : i32 to vector<1x512xi32>
    %23 = arith.cmpi sgt, %21, %22 : vector<1x512xi32>
    %c31_i32 = arith.constant 31 : i32
    %24 = vector.broadcast %c31_i32 : i32 to vector<1x512xi32>
    %25 = arith.cmpi slt, %21, %24 : vector<1x512xi32>
    %c0_7 = arith.constant 0 : index
    %c0_8 = arith.constant 0 : index
    %c0_9 = arith.constant 0 : index
    %c0_10 = arith.constant 0 : index
    %26 = vector.load %arg2[%c0_7, %c0_8, %c0_9, %c0_10] : memref<1x1x8x578xf32, #tpu.memory_space<vmem>>, vector<1x1x8x512xf32>
    %27 = vector.shape_cast %26 : vector<1x1x8x512xf32> to vector<8x512xf32>
    %cst = arith.constant 0.000000e+00 : f32
    %28 = vector.shape_cast %23 : vector<1x512xi1> to vector<1x512xi1>
    %29 = vector.broadcast %28 : vector<1x512xi1> to vector<8x512xi1>
    %30 = vector.broadcast %cst : f32 to vector<8x512xf32>
    %31 = arith.select %29, %27, %30 : vector<8x512xi1>, vector<8x512xf32>
    %c0_11 = arith.constant 0 : index
    %c0_12 = arith.constant 0 : index
    %c0_13 = arith.constant 0 : index
    %c1 = arith.constant 1 : index
    %32 = vector.load %arg2[%c0_11, %c0_12, %c0_13, %c1] : memref<1x1x8x578xf32, #tpu.memory_space<vmem>>, vector<1x1x8x512xf32>
    %33 = vector.shape_cast %32 : vector<1x1x8x512xf32> to vector<8x512xf32>
    %c0_14 = arith.constant 0 : index
    %c0_15 = arith.constant 0 : index
    %c0_16 = arith.constant 0 : index
    %c2 = arith.constant 2 : index
    %34 = vector.load %arg2[%c0_14, %c0_15, %c0_16, %c2] : memref<1x1x8x578xf32, #tpu.memory_space<vmem>>, vector<1x1x8x512xf32>
    %35 = vector.shape_cast %34 : vector<1x1x8x512xf32> to vector<8x512xf32>
    %cst_17 = arith.constant 0.000000e+00 : f32
    %36 = vector.shape_cast %25 : vector<1x512xi1> to vector<1x512xi1>
    %37 = vector.broadcast %36 : vector<1x512xi1> to vector<8x512xi1>
    %38 = vector.broadcast %cst_17 : f32 to vector<8x512xf32>
    %39 = arith.select %37, %35, %38 : vector<8x512xi1>, vector<8x512xf32>
    %c0_18 = arith.constant 0 : index
    %c0_19 = arith.constant 0 : index
    %c0_20 = arith.constant 0 : index
    %c32 = arith.constant 32 : index
    %40 = vector.load %arg2[%c0_18, %c0_19, %c0_20, %c32] : memref<1x1x8x578xf32, #tpu.memory_space<vmem>>, vector<1x1x8x512xf32>
    %41 = vector.shape_cast %40 : vector<1x1x8x512xf32> to vector<8x512xf32>
    %cst_21 = arith.constant 0.000000e+00 : f32
    %42 = vector.shape_cast %23 : vector<1x512xi1> to vector<1x512xi1>
    %43 = vector.broadcast %42 : vector<1x512xi1> to vector<8x512xi1>
    %44 = vector.broadcast %cst_21 : f32 to vector<8x512xf32>
    %45 = arith.select %43, %41, %44 : vector<8x512xi1>, vector<8x512xf32>
    %c0_22 = arith.constant 0 : index
    %c0_23 = arith.constant 0 : index
    %c0_24 = arith.constant 0 : index
    %c33 = arith.constant 33 : index
    %46 = vector.load %arg2[%c0_22, %c0_23, %c0_24, %c33] : memref<1x1x8x578xf32, #tpu.memory_space<vmem>>, vector<1x1x8x512xf32>
    %47 = vector.shape_cast %46 : vector<1x1x8x512xf32> to vector<8x512xf32>
    %c0_25 = arith.constant 0 : index
    %c0_26 = arith.constant 0 : index
    %c0_27 = arith.constant 0 : index
    %c34 = arith.constant 34 : index
    %48 = vector.load %arg2[%c0_25, %c0_26, %c0_27, %c34] : memref<1x1x8x578xf32, #tpu.memory_space<vmem>>, vector<1x1x8x512xf32>
    %49 = vector.shape_cast %48 : vector<1x1x8x512xf32> to vector<8x512xf32>
    %cst_28 = arith.constant 0.000000e+00 : f32
    %50 = vector.shape_cast %25 : vector<1x512xi1> to vector<1x512xi1>
    %51 = vector.broadcast %50 : vector<1x512xi1> to vector<8x512xi1>
    %52 = vector.broadcast %cst_28 : f32 to vector<8x512xf32>
    %53 = arith.select %51, %49, %52 : vector<8x512xi1>, vector<8x512xf32>
    %c0_29 = arith.constant 0 : index
    %c0_30 = arith.constant 0 : index
    %c0_31 = arith.constant 0 : index
    %c64 = arith.constant 64 : index
    %54 = vector.load %arg2[%c0_29, %c0_30, %c0_31, %c64] : memref<1x1x8x578xf32, #tpu.memory_space<vmem>>, vector<1x1x8x512xf32>
    %55 = vector.shape_cast %54 : vector<1x1x8x512xf32> to vector<8x512xf32>
    %cst_32 = arith.constant 0.000000e+00 : f32
    %56 = vector.shape_cast %23 : vector<1x512xi1> to vector<1x512xi1>
    %57 = vector.broadcast %56 : vector<1x512xi1> to vector<8x512xi1>
    %58 = vector.broadcast %cst_32 : f32 to vector<8x512xf32>
    %59 = arith.select %57, %55, %58 : vector<8x512xi1>, vector<8x512xf32>
    %c0_33 = arith.constant 0 : index
    %c0_34 = arith.constant 0 : index
    %c0_35 = arith.constant 0 : index
    %c65 = arith.constant 65 : index
    %60 = vector.load %arg2[%c0_33, %c0_34, %c0_35, %c65] : memref<1x1x8x578xf32, #tpu.memory_space<vmem>>, vector<1x1x8x512xf32>
    %61 = vector.shape_cast %60 : vector<1x1x8x512xf32> to vector<8x512xf32>
    %c0_36 = arith.constant 0 : index
    %c0_37 = arith.constant 0 : index
    %c0_38 = arith.constant 0 : index
    %c66 = arith.constant 66 : index
    %62 = vector.load %arg2[%c0_36, %c0_37, %c0_38, %c66] : memref<1x1x8x578xf32, #tpu.memory_space<vmem>>, vector<1x1x8x512xf32>
    %63 = vector.shape_cast %62 : vector<1x1x8x512xf32> to vector<8x512xf32>
    %cst_39 = arith.constant 0.000000e+00 : f32
    %64 = vector.shape_cast %25 : vector<1x512xi1> to vector<1x512xi1>
    %65 = vector.broadcast %64 : vector<1x512xi1> to vector<8x512xi1>
    %66 = vector.broadcast %cst_39 : f32 to vector<8x512xf32>
    %67 = arith.select %65, %63, %66 : vector<8x512xi1>, vector<8x512xf32>
    %68 = tpu.concatenate %31, %33, %39, %45, %47, %53, %59, %61, %67 in 0 : vector<8x512xf32>, vector<8x512xf32>, vector<8x512xf32>, vector<8x512xf32>, vector<8x512xf32>, vector<8x512xf32>, vector<8x512xf32>, vector<8x512xf32>, vector<8x512xf32> -> vector<72x512xf32>
    %cst_40 = arith.constant dense<0.000000e+00> : vector<4x512xf32>
    %69 = tpu.matmul %4, %68, %cst_40 {dimension_numbers = #tpu.dot_dimension_numbers<[1], [0], [0], [1], [0, 0, 1, 1], [], []>} : vector<4x72xf32>, vector<72x512xf32>, vector<4x512xf32> -> vector<4x512xf32>
    %70 = vector.broadcast %5 : vector<4x1xf32> to vector<4x512xf32>
    %71 = arith.addf %69, %70 : vector<4x512xf32>
    %c0_41 = arith.constant 0 : index
    %c0_42 = arith.constant 0 : index
    %72 = vector.load %arg5[%c0_41, %c0_42] : memref<4x4xf32, #tpu.memory_space<vmem>>, vector<4x4xf32>
    %73 = arith.mulf %71, %71 : vector<4x512xf32>
    %cst_43 = arith.constant dense<0.000000e+00> : vector<4x512xf32>
    %74 = tpu.matmul %72, %73, %cst_43 {dimension_numbers = #tpu.dot_dimension_numbers<[1], [0], [0], [1], [0, 0, 1, 1], [], []>} : vector<4x4xf32>, vector<4x512xf32>, vector<4x512xf32> -> vector<4x512xf32>
    %c0_44 = arith.constant 0 : index
    %c0_45 = arith.constant 0 : index
    %75 = vector.load %arg6[%c0_44, %c0_45] : memref<4x1xf32, #tpu.memory_space<vmem>>, vector<4x1xf32>
    %76 = vector.broadcast %75 : vector<4x1xf32> to vector<4x512xf32>
    %77 = arith.addf %74, %76 : vector<4x512xf32>
    %78 = math.sqrt %77 : vector<4x512xf32>
    %79 = arith.mulf %71, %78 : vector<4x512xf32>
    %c0_46 = arith.constant 0 : index
    %c0_47 = arith.constant 0 : index
    %c0_48 = arith.constant 0 : index
    %80 = vector.load %arg7[%c0_46, %c0_47, %c0_48] : memref<1x4x512xf32, #tpu.memory_space<vmem>>, vector<1x4x512xf32>
    %81 = vector.shape_cast %80 : vector<1x4x512xf32> to vector<4x512xf32>
    %82 = vector.shape_cast %79 : vector<4x512xf32> to vector<1x4x512xf32>
    tpu.vector_store %arg7[%c0_46, %c0_47, %c0_48], %82 {strides = array<i32>} : memref<1x4x512xf32, #tpu.memory_space<vmem>>, vector<1x4x512xf32>,
    %c1024_i32 = arith.constant 1024 : i32
    %83 = vector.broadcast %c1024_i32 : i32 to vector<1x512xi32>
    %84 = arith.cmpi slt, %3, %83 : vector<1x512xi32>
    %cst_49 = arith.constant 0.000000e+00 : f32
    %85 = vector.shape_cast %84 : vector<1x512xi1> to vector<1x512xi1>
    %86 = vector.broadcast %85 : vector<1x512xi1> to vector<4x512xi1>
    %87 = vector.broadcast %cst_49 : f32 to vector<4x512xf32>
    %88 = arith.select %86, %79, %87 : vector<4x512xi1>, vector<4x512xf32>
    %cst_50 = arith.constant dense<0.000000e+00> : vector<4xf32>
    %89 = vector.multi_reduction <add>, %88, %cst_50 [1] : vector<4x512xf32> to vector<4xf32>
    %90 = vector.shape_cast %89 : vector<4xf32> to vector<4x1xf32>
    %c0_i32_51 = arith.constant 0 : i32
    %91 = arith.cmpi eq, %arg1, %c0_i32_51 : i32
    %92 = arith.extui %91 : i1 to i32
    %c0_i32_52 = arith.constant 0 : i32
    %93 = arith.cmpi ne, %92, %c0_i32_52 : i32
    scf.if %93 {
      %cst_59 = arith.constant 0.000000e+00 : f32
      %100 = vector.broadcast %cst_59 : f32 to vector<4x1xf32>
      %c0_60 = arith.constant 0 : index
      %c0_61 = arith.constant 0 : index
      %c0_62 = arith.constant 0 : index
      %101 = vector.load %arg8[%c0_60, %c0_61, %c0_62] : memref<1x4x1xf32, #tpu.memory_space<vmem>>, vector<1x4x1xf32>
      %102 = vector.shape_cast %101 : vector<1x4x1xf32> to vector<4x1xf32>
      %103 = vector.shape_cast %100 : vector<4x1xf32> to vector<1x4x1xf32>
      tpu.vector_store %arg8[%c0_60, %c0_61, %c0_62], %103 {strides = array<i32>} : memref<1x4x1xf32, #tpu.memory_space<vmem>>, vector<1x4x1xf32>,
    } else {
    }
    %c0_53 = arith.constant 0 : index
    %c0_54 = arith.constant 0 : index
    %c0_55 = arith.constant 0 : index
    %94 = vector.load %arg8[%c0_53, %c0_54, %c0_55] : memref<1x4x1xf32, #tpu.memory_space<vmem>>, vector<1x4x1xf32>
    %95 = vector.shape_cast %94 : vector<1x4x1xf32> to vector<4x1xf32>
    %96 = arith.addf %95, %90 : vector<4x1xf32>
    %c0_56 = arith.constant 0 : index
    %c0_57 = arith.constant 0 : index
    %c0_58 = arith.constant 0 : index
    %97 = vector.load %arg8[%c0_56, %c0_57, %c0_58] : memref<1x4x1xf32, #tpu.memory_space<vmem>>, vector<1x4x1xf32>
    %98 = vector.shape_cast %97 : vector<1x4x1xf32> to vector<4x1xf32>
    %99 = vector.shape_cast %96 : vector<4x1xf32> to vector<1x4x1xf32>
    tpu.vector_store %arg8[%c0_56, %c0_57, %c0_58], %99 {strides = array<i32>} : memref<1x4x1xf32, #tpu.memory_space<vmem>>, vector<1x4x1xf32>,
    return
  }
  func.func @transform_0(%arg0: i32, %arg1: i32) -> (i32, i32, i32, i32) {
    %c0_i32 = arith.constant 0 : i32
    %c0_i32_0 = arith.constant 0 : i32
    %c0_i32_1 = arith.constant 0 : i32
    return %arg0, %arg1, %c0_i32, %c0_i32_0 : i32, i32, i32, i32
  }
  func.func @transform_1(%arg0: i32, %arg1: i32) -> (i32, i32) {
    %c0_i32 = arith.constant 0 : i32
    %c0_i32_0 = arith.constant 0 : i32
    %c0_i32_1 = arith.constant 0 : i32
    return %c0_i32, %c0_i32_0 : i32, i32
  }
  func.func @transform_2(%arg0: i32, %arg1: i32) -> (i32, i32) {
    %c0_i32 = arith.constant 0 : i32
    %c0_i32_0 = arith.constant 0 : i32
    %c0_i32_1 = arith.constant 0 : i32
    return %c0_i32, %c0_i32_0 : i32, i32
  }
  func.func @transform_3(%arg0: i32, %arg1: i32) -> (i32, i32) {
    %c0_i32 = arith.constant 0 : i32
    %c0_i32_0 = arith.constant 0 : i32
    %c0_i32_1 = arith.constant 0 : i32
    return %c0_i32, %c0_i32_0 : i32, i32
  }
  func.func @transform_4(%arg0: i32, %arg1: i32) -> (i32, i32) {
    %c0_i32 = arith.constant 0 : i32
    %c0_i32_0 = arith.constant 0 : i32
    %c0_i32_1 = arith.constant 0 : i32
    return %c0_i32, %c0_i32_0 : i32, i32
  }
  func.func @transform_5(%arg0: i32, %arg1: i32) -> (i32, i32, i32) {
    %c0_i32 = arith.constant 0 : i32
    %c0_i32_0 = arith.constant 0 : i32
    return %arg0, %c0_i32, %arg1 : i32, i32, i32
  }
  func.func @transform_6(%arg0: i32, %arg1: i32) -> (i32, i32, i32) {
    %c0_i32 = arith.constant 0 : i32
    %c0_i32_0 = arith.constant 0 : i32
    %c0_i32_1 = arith.constant 0 : i32
    return %arg0, %c0_i32, %c0_i32_0 : i32, i32, i32
  }
}

module attributes {stable_mosaic.version = 11 : i64} {
  func.func @_gate_residual_kernel(%arg0: i32, %arg1: i32, %arg2: memref<1x4x512xf32, #tpu.memory_space<vmem>>, %arg3: memref<1x4x1xf32, #tpu.memory_space<vmem>>, %arg4: memref<4x4xf32, #tpu.memory_space<vmem>>, %arg5: memref<1x4x512xf32, #tpu.memory_space<vmem>>, %arg6: memref<1x4x512xf32, #tpu.memory_space<vmem>>) attributes {dimension_semantics = [#tpu.dimension_semantics<parallel>, #tpu.dimension_semantics<parallel>], iteration_bounds = array<i64: 2, 2>, scalar_prefetch = 0 : i64, scratch_operands = 0 : i64, tpu.core_type = #tpu.core_type<tc>, window_params = [{transform_indices = @transform_0, window_bounds = array<i64: 1, 4, 512>}, {transform_indices = @transform_1, window_bounds = array<i64: 1, 4, 1>}, {pipeline_mode = #tpu.pipeline_mode<synchronous>, transform_indices = @transform_2, window_bounds = array<i64: 4, 4>}, {transform_indices = @transform_3, window_bounds = array<i64: 1, 4, 512>}, {transform_indices = @transform_4, window_bounds = array<i64: 1, 4, 512>}]} {
    %c0 = arith.constant 0 : index
    %c0_0 = arith.constant 0 : index
    %0 = vector.load %arg4[%c0, %c0_0] : memref<4x4xf32, #tpu.memory_space<vmem>>, vector<4x4xf32>
    %c0_1 = arith.constant 0 : index
    %c0_2 = arith.constant 0 : index
    %c0_3 = arith.constant 0 : index
    %1 = vector.load %arg3[%c0_1, %c0_2, %c0_3] : memref<1x4x1xf32, #tpu.memory_space<vmem>>, vector<1x4x1xf32>
    %2 = vector.shape_cast %1 : vector<1x4x1xf32> to vector<4x1xf32>
    %cst = arith.constant 9.765625E-4 : f32
    %3 = vector.broadcast %cst : f32 to vector<4x1xf32>
    %4 = arith.mulf %2, %3 : vector<4x1xf32>
    %cst_4 = arith.constant dense<0.000000e+00> : vector<4x1xf32>
    %5 = tpu.matmul %0, %4, %cst_4 {dimension_numbers = #tpu.dot_dimension_numbers<[1], [0], [0], [1], [0, 0, 1, 1], [], []>} : vector<4x4xf32>, vector<4x1xf32>, vector<4x1xf32> -> vector<4x1xf32>
    %6 = arith.negf %5 : vector<4x1xf32>
    %7 = math.exp %6 : vector<4x1xf32>
    %cst_5 = arith.constant 1.000000e+00 : f32
    %8 = vector.broadcast %cst_5 : f32 to vector<4x1xf32>
    %9 = arith.addf %8, %7 : vector<4x1xf32>
    %10 = arith.divf %8, %9 : vector<4x1xf32>
    %c0_6 = arith.constant 0 : index
    %c0_7 = arith.constant 0 : index
    %c0_8 = arith.constant 0 : index
    %11 = vector.load %arg2[%c0_6, %c0_7, %c0_8] : memref<1x4x512xf32, #tpu.memory_space<vmem>>, vector<1x4x512xf32>
    %12 = vector.shape_cast %11 : vector<1x4x512xf32> to vector<4x512xf32>
    %13 = vector.broadcast %10 : vector<4x1xf32> to vector<4x512xf32>
    %14 = arith.mulf %12, %13 : vector<4x512xf32>
    %c0_9 = arith.constant 0 : index
    %c0_10 = arith.constant 0 : index
    %c0_11 = arith.constant 0 : index
    %15 = vector.load %arg5[%c0_9, %c0_10, %c0_11] : memref<1x4x512xf32, #tpu.memory_space<vmem>>, vector<1x4x512xf32>
    %16 = vector.shape_cast %15 : vector<1x4x512xf32> to vector<4x512xf32>
    %17 = arith.addf %14, %16 : vector<4x512xf32>
    %c0_12 = arith.constant 0 : index
    %c0_13 = arith.constant 0 : index
    %c0_14 = arith.constant 0 : index
    %18 = vector.load %arg6[%c0_12, %c0_13, %c0_14] : memref<1x4x512xf32, #tpu.memory_space<vmem>>, vector<1x4x512xf32>
    %19 = vector.shape_cast %18 : vector<1x4x512xf32> to vector<4x512xf32>
    %20 = vector.shape_cast %17 : vector<4x512xf32> to vector<1x4x512xf32>
    tpu.vector_store %arg6[%c0_12, %c0_13, %c0_14], %20 {strides = array<i32>} : memref<1x4x512xf32, #tpu.memory_space<vmem>>, vector<1x4x512xf32>,
    return
  }
  func.func @transform_0(%arg0: i32, %arg1: i32) -> (i32, i32, i32) {
    %c0_i32 = arith.constant 0 : i32
    %c0_i32_0 = arith.constant 0 : i32
    return %arg0, %c0_i32, %arg1 : i32, i32, i32
  }
  func.func @transform_1(%arg0: i32, %arg1: i32) -> (i32, i32, i32) {
    %c0_i32 = arith.constant 0 : i32
    %c0_i32_0 = arith.constant 0 : i32
    %c0_i32_1 = arith.constant 0 : i32
    return %arg0, %c0_i32, %c0_i32_0 : i32, i32, i32
  }
  func.func @transform_2(%arg0: i32, %arg1: i32) -> (i32, i32) {
    %c0_i32 = arith.constant 0 : i32
    %c0_i32_0 = arith.constant 0 : i32
    %c0_i32_1 = arith.constant 0 : i32
    return %c0_i32, %c0_i32_0 : i32, i32
  }
  func.func @transform_3(%arg0: i32, %arg1: i32) -> (i32, i32, i32) {
    %c0_i32 = arith.constant 0 : i32
    %c0_i32_0 = arith.constant 0 : i32
    return %arg0, %c0_i32, %arg1 : i32, i32, i32
  }
  func.func @transform_4(%arg0: i32, %arg1: i32) -> (i32, i32, i32) {
    %c0_i32 = arith.constant 0 : i32
    %c0_i32_0 = arith.constant 0 : i32
    return %arg0, %c0_i32, %arg1 : i32, i32, i32
  }
}

</mosaic_0001>

<bundles_post_ra>
// kernel: res_block_up.3
= control target key start
LH: loop header
LB: loop body
LE: loop exit
PB: predicated region body
PF: predicated region fallthrough
CT: control target
= control target key end

     0   :  { %s720_s12 = smov 0   ;;  %s722_s13 = smov 0   ;;  %s881_s0 = inlined_call_operand.vmem [shape: f32[2,1,8,290], index: 0, kind: input, shape index: {}]   ;;  %s882_s1 = inlined_call_operand.vmem [shape: f32[32,72], index: 1, kind: input, shape index: {}]   ;;  %s883_s2 = inlined_call_operand.vmem [shape: f32[32,1], index: 2, kind: input, shape index: {}]   ;;  %s884_s3 = inlined_call_operand.vmem [shape: f32[2,32,256], index: 3, kind: output, shape index: {}]  }
   0x1   :  { %s724_s14 = smov 0  }
   0x2 LB: > { %s25_s15 = sadd.s32 1, %s685_s13  ;;  %p570_p0 = scmp.ge.s32.totalorder %s689_s14, 1  ;;  %s689_s14 = sphi %s724_s14, %s13_s14   ;;  %s685_s13 = sphi %s722_s13, %s894_s13   ;;  %s681_s12 = sphi %s720_s12, %s893_s12  }
   0x3   : > { %p27_p1 = scmp.ge.s32.totalorder %s25_s15, 2  ;;  %p157_p2 = scmp.lt.s32.totalorder %s689_s14, 3 }
   0x5   : > { %s896_s15 = smov (%p27_p1, %s25_s15), 0  ;;  %p158_p3 = pnand %p570_p0, %p157_p2 }
   0x6   : > { %p189_p4 = scmp.lt.s32.totalorder (!%p158_p3), %s681_s12, 1  ;;  %s691_s20 = smov (!%p158_p3), 94  }
   0x7   : > { %161 = sbr.rel (%p158_p3) target bundleno = 331 (0x14b), region = 32  ;;  %s692_s21 = smov (!%p158_p3), 95  }
   0x8   : > { %s693_s22 = smov (!%p158_p3), 96   ;;  %s694_s23 = smov (!%p158_p3), 110  }
   0x9   : > { %s695_s24 = smov (!%p158_p3), 111   ;;  %s696_s25 = smov (!%p158_p3), 112  }
   0xa   : > { %s697_s26 = smov (!%p158_p3), 126   ;;  %s698_s27 = smov (!%p158_p3), 127  }
   0xc   : > { %s898_s12 = smov (!%p189_p4, %s681_s12), 1  ;;  %v208_v5 = vlaneseq  ;;  %vm325_vm0 = vcmask 769024   ;;  %vm360_vm3 = vcmask 777216   ;;  %vm312_vm4 = vcmask 785408   ;;  %v244_v44 = vld [vmem:[%s883_s2 + $0x8] sm:$0xff]  ;;  %v243_v45 = vld [vmem:[%s883_s2] sm:$0xff] }
   0xd   : > { %s615_s16 = smul.u32 24, %s898_s12  ;;  %vm299_vm7 = vcmask 900096   ;;  %vm349_vm8 = vcmask 908288   ;;  %v699_v39 = vmov 0   ;;  %vm286_vm9 = vcmask 916480   ;;  %v245_v46 = vld [vmem:[%s883_s2 + $0x10] sm:$0xff] }
   0xe   : > { %v209_v6 = vand.u32 127, %v208_v5  ;;  %665 = vset.pattern.permute.xlu1 %v699_v39  ;;  %664 = vset.pattern.permute.xlu0 %v699_v39  ;;  %vm273_vm10 = vcmask 1031168   ;;  %v246_v52 = vld [vmem:[%s883_s2 + $0x18] sm:$0xff]  ;;  %vm338_vm11 = vcmask 1039360   ;;  %v239_v61 = vld [vmem:[%s882_s1] sm:$0xff]  ;;  %vm385_vm12 = vcmask 588800  }
   0xf   : > { %s197_s19 = scalar_lea.vmem %s881_s0, %s615_s16  ;;  %666 = vset.pattern.permute.xlu2 %v699_v39  ;;  %v241_v62 = vld [vmem:[%s882_s1 + $0x10] sm:$0xff]  ;;  %v240_v63 = vld [vmem:[%s882_s1 + $0x8] sm:$0xff] }
  0x10   : > { %v259_v0 = vld [vmem:[%s197_s19 + $0x10] sm:$0xff]  ;;  %v744_v1 = vld [vmem:[%s197_s19] sm:$0xff]  ;;  %v747_v2 = vld [vmem:[%s197_s19 + $0x8] sm:$0xff]  ;;  %v210_v10 = vadd.s32 128, %v209_v6  ;;  %v219_v11 = vand.u32 15, %v209_v6 }
  0x11   : > { %323 = vrot.lane.b32.xlu1 %v259_v0, %s691_s20  ;;  %319 = vrot.lane.b32.xlu0 %v744_v1, %s691_s20  ;;  %v649_v3 = vpack.i.bf16 %v747_v2, %v744_v1 }
  0x12   : > { %358 = vrot.lane.b32.xlu2 %v259_v0, %s692_s21  ;;  %v226_v12 = vand.u32 15, %v210_v10  ;;  %vm760_vm1 = vcmp.lt.s32.totalorder %v219_v11, 15  ;;  %vm776_vm5 = vcmp.gt.s32.totalorder %v219_v11, 0 }
  0x14   : > { %vm764_vm2 = vcmp.lt.s32.totalorder %v226_v12, 15  ;;  %vm780_vm6 = vcmp.gt.s32.totalorder %v226_v12, 0 }
  0x19   : > { %650 = vrot.lane.b32.xlu1 %v649_v3, %s692_s21  ;;  %321 = vrot.lane.b32.xlu0 %v747_v2, %s691_s20  ;;  %s596_s21 = sshll.u32 %s898_s12, 6 }
  0x1a   : > { %306 = vrot.lane.b32.xlu2 %v744_v1, %s693_s22 }
  0x21   : > { %310 = vrot.lane.b32.xlu1 %v259_v0, %s693_s22  ;;  %308 = vrot.lane.b32.xlu0 %v747_v2, %s693_s22 }
  0x22   : > { %293 = vrot.lane.b32.xlu2 %v744_v1, %s694_s23 }
  0x29   : > { %297 = vrot.lane.b32.xlu1 %v259_v0, %s694_s23  ;;  %295 = vrot.lane.b32.xlu0 %v747_v2, %s694_s23 }
  0x2a   : > { %655 = vrot.lane.b32.xlu2 %v649_v3, %s695_s24 }
  0x31   : > { %280 = vrot.lane.b32.xlu1 %v744_v1, %s696_s25  ;;  %347 = vrot.lane.b32.xlu0 %v259_v0, %s695_s24  ;;  %s862_s24 = scalar_lea.vmem %s884_s3, %s596_s21 }
  0x32   : > { %282 = vrot.lane.b32.xlu2 %v747_v2, %s696_s25 }
  0x39   : > { %267 = vrot.lane.b32.xlu1 %v744_v1, %s697_s26  ;;  %284 = vrot.lane.b32.xlu0 %v259_v0, %s696_s25 }
  0x3a   : > { %269 = vrot.lane.b32.xlu2 %v747_v2, %s697_s26 }
  0x41   : > { %660 = vrot.lane.b32.xlu1 %v649_v3, %s698_s27  ;;  %271 = vrot.lane.b32.xlu0 %v259_v0, %s697_s26 }
  0x42   : > { %336 = vrot.lane.b32.xlu2 %v259_v0, %s698_s27  ;;  %v242_v0 = vld [vmem:[%s882_s1 + $0x18] sm:$0xff] }
  0x49   : > { %372 = vperm.xlu1 %665, %v244_v44   ;;  %367 = vperm.xlu0 %664, %v243_v45  }
  0x4a   : > { %377 = vperm.xlu2 %666, %v245_v46  }
  0x51   : > { %382 = vperm.xlu1 %665, %v246_v52  }
  0x6c   : > { %v359_v4 = vpop.permute.xlu2 %358 }
  0x74   : > { %v307_v7 = vpop.permute.xlu2 %306 }
  0x7c   : > { %v294_v14 = vpop.permute.xlu2 %293 }
  0x83   : > { %v324_v8 = vpop.permute.xlu1 %323  ;;  %v320_v9 = vpop.permute.xlu0 %319 }
  0x84   : > { %v656_v30 = vpop.permute.xlu2 %655 }
  0x85   : > { %v658_v31 = vunpack.i.h.bf16 %v656_v30  ;;  %v657_v32 = vunpack.i.l.bf16 %v656_v30 }
  0x87   : > { %v350_v37 = vsel %vm349_vm8, %v657_v32, %v658_v31 }
  0x8b   : > { %v651_v15 = vpop.permute.xlu1 %650  ;;  %v322_v16 = vpop.permute.xlu0 %321 }
  0x8c   : > { %v653_v18 = vunpack.i.h.bf16 %v651_v15  ;;  %v652_v19 = vunpack.i.l.bf16 %v651_v15  ;;  %v326_v20 = vsel %vm325_vm0, %v320_v9, %v322_v16  ;;  %v327_v21 = vsel %vm325_vm0, %v322_v16, %v324_v8  ;;  %v283_v38 = vpop.permute.xlu2 %282 }
  0x8d   : > { %574 = vmatpush.msk.msra.mxu0 %vm760_vm1, %v326_v20  ;;  %597 = vmatpush.msk.msra.mxu2 %vm760_vm1, %v326_v20 }
  0x8e   : > { %584 = vmatpush.msk.msra.mxu1 %vm764_vm2, %v327_v21  ;;  %606 = vmatpush.msk.msra.mxu3 %vm764_vm2, %v327_v21  ;;  %v361_v22 = vsel %vm360_vm3, %v652_v19, %v653_v18  ;;  %v362_v23 = vsel %vm360_vm3, %v653_v18, %v359_v4 }
  0x8f   : > { %406 = vmatpush.msra.mxu0 %v361_v22  ;;  %598 = vmatpush.msra.mxu2 %v361_v22 }
  0x90   : > { %435 = vmatpush.msra.mxu1 %v362_v23  ;;  %607 = vmatpush.msra.mxu3 %v362_v23 }
  0x93   : > { %v311_v25 = vpop.permute.xlu1 %310  ;;  %v309_v26 = vpop.permute.xlu0 %308 }
  0x94   : > { %v313_v28 = vsel %vm312_vm4, %v307_v7, %v309_v26  ;;  %v314_v29 = vsel %vm312_vm4, %v309_v26, %v311_v25  ;;  %v270_v47 = vpop.permute.xlu2 %269 }
  0x95   : > { %575 = vmatpush.msk.msra.mxu0 %vm776_vm5, %v313_v28  ;;  %599 = vmatpush.msk.msra.mxu2 %vm776_vm5, %v313_v28 }
  0x96   : > { %585 = vmatpush.msk.msra.mxu1 %vm780_vm6, %v314_v29  ;;  %608 = vmatpush.msk.msra.mxu3 %vm780_vm6, %v314_v29 }
  0x9b   : > { %v298_v33 = vpop.permute.xlu1 %297  ;;  %v296_v34 = vpop.permute.xlu0 %295 }
  0x9c   : > { %v300_v35 = vsel %vm299_vm7, %v294_v14, %v296_v34  ;;  %v301_v36 = vsel %vm299_vm7, %v296_v34, %v298_v33  ;;  %v337_v53 = vpop.permute.xlu2 %336 }
  0x9d   : > { %576 = vmatpush.msk.msra.mxu0 %vm760_vm1, %v300_v35  ;;  %600 = vmatpush.msk.msra.mxu2 %vm760_vm1, %v300_v35 }
  0x9e   : > { %586 = vmatpush.msk.msra.mxu1 %vm764_vm2, %v301_v36  ;;  %609 = vmatpush.msk.msra.mxu3 %vm764_vm2, %v301_v36 }
  0x9f   : > { %409 = vmatpush.msra.mxu0 %v350_v37  ;;  %601 = vmatpush.msra.mxu2 %v350_v37 }
  0xa3   : > { %v281_v40 = vpop.permute.xlu1 %280  ;;  %v348_v41 = vpop.permute.xlu0 %347 }
  0xa4   : > { %v287_v42 = vsel %vm286_vm9, %v281_v40, %v283_v38  ;;  %v351_v43 = vsel %vm349_vm8, %v658_v31, %v348_v41  ;;  %v378_v9 = vpop.permute.xlu2 %377 }
  0xa5   : > { %577 = vmatpush.msk.msra.mxu0 %vm776_vm5, %v287_v42  ;;  %602 = vmatpush.msk.msra.mxu2 %vm776_vm5, %v287_v42 }
  0xa6   : > { %438 = vmatpush.msra.mxu1 %v351_v43  ;;  %610 = vmatpush.msra.mxu3 %v351_v43 }
  0xab   : > { %v268_v48 = vpop.permute.xlu1 %267  ;;  %v285_v49 = vpop.permute.xlu0 %284 }
  0xac   : > { %v274_v50 = vsel %vm273_vm10, %v268_v48, %v270_v47  ;;  %v288_v51 = vsel %vm286_vm9, %v283_v38, %v285_v49 }
  0xad   : > { %578 = vmatpush.msk.msra.mxu0 %vm760_vm1, %v274_v50  ;;  %603 = vmatpush.msk.msra.mxu2 %vm760_vm1, %v274_v50 }
  0xae   : > { %587 = vmatpush.msk.msra.mxu1 %vm780_vm6, %v288_v51  ;;  %611 = vmatpush.msk.msra.mxu3 %vm780_vm6, %v288_v51 }
  0xb3   : > { %v661_v54 = vpop.permute.xlu1 %660  ;;  %v272_v55 = vpop.permute.xlu0 %271 }
  0xb4   : > { %v663_v56 = vunpack.i.h.bf16 %v661_v54  ;;  %v662_v57 = vunpack.i.l.bf16 %v661_v54  ;;  %v275_v58 = vsel %vm273_vm10, %v270_v47, %v272_v55 }
  0xb5   : > { %588 = vmatpush.msk.msra.mxu1 %vm764_vm2, %v275_v58  ;;  %612 = vmatpush.msk.msra.mxu3 %vm764_vm2, %v275_v58 }
  0xb6   : > { %v339_v59 = vsel %vm338_vm11, %v662_v57, %v663_v56  ;;  %v340_v60 = vsel %vm338_vm11, %v663_v56, %v337_v53 }
  0xb7   : > { %412 = vmatpush.msra.mxu0 %v339_v59  ;;  %604 = vmatpush.msra.mxu2 %v339_v59 }
  0xb8   : > { %441 = vmatpush.msra.mxu1 %v340_v60  ;;  %613 = vmatpush.msra.mxu3 %v340_v60 }
  0xb9   : > { %579 = vmatpush.msk.msra.mxu0 %vm776_vm5, %v744_v1  ;;  %605 = vmatpush.msk.msra.mxu2 %vm776_vm5, %v744_v1 }
  0xba   : > { %589 = vmatpush.msk.msra.mxu1 %vm780_vm6, %v747_v2  ;;  %614 = vmatpush.msk.msra.mxu3 %vm780_vm6, %v747_v2 }
  0xbb   : > { %580 = vmatmul.msk.f32.vlgmr.msra.gmra.mxu0 %vm385_vm12, %v239_v61  ;;  %582 = vmatmul.msk.f32.vlgmr.msra.gmra.mxu2 %vm385_vm12, %v241_v62  ;;  %v368_v1 = vpop.permute.xlu0 %367  ;;  %v373_v7 = vpop.permute.xlu1 %372 }
  0xbc   : > { %590 = vmatmul.msk.f32.vlgmr.msra.gmra.mxu1 %vm385_vm12, %v239_v61  ;;  %592 = vmatmul.msk.f32.vlgmr.msra.gmra.mxu3 %vm385_vm12, %v241_v62 }
  0xc3   : > { %581 = vmatmul.msk.f32.gmra.mxu0 %vm385_vm12, %v240_v63  ;;  %583 = vmatmul.msk.f32.gmra.mxu2 %vm385_vm12, %v242_v0  ;;  %v383_v23 = vpop.permute.xlu1 %382 }
  0xc4   : > { %591 = vmatmul.msk.f32.gmra.mxu1 %vm385_vm12, %v240_v63  ;;  %593 = vmatmul.msk.f32.gmra.mxu3 %vm385_vm12, %v242_v0 }
 0x138   : > { %v415_v3 = vpop.f32.mrf.mxu0 }
 0x139   : > { %v444_v2 = vpop.f32.mrf.mxu1  ;;  %v416_v4 = vadd.f32 %v415_v3, %v368_v1 }
 0x13a   : > { %v445_v5 = vadd.f32 %v444_v2, %v368_v1 }
 0x13b   : > { %vm456_vm13 = vcmp.ge.f32.partialorder %v416_v4, 0.0  ;;  %v460_v6 = vmul.f32 0.01, %v416_v4 }
 0x13c   : > { %vm457_vm14 = vcmp.ge.f32.partialorder %v445_v5, 0.0  ;;  %v461_v8 = vmul.f32 0.01, %v445_v5 }
 0x13d   : > { %v464_v10 = vsel %vm456_vm13, %v416_v4, %v460_v6 }
 0x13e   : > { %v465_v11 = vsel %vm457_vm14, %v445_v5, %v461_v8  ;;  %468 = vst [vmem:[%s862_s24] sm:$0xff] %v464_v10  ;;  %v421_v12 = vpop.f32.mrf.mxu2 }
 0x13f   : > { %469 = vst [vmem:[%s862_s24 + $0x8] sm:$0xff] %v465_v11  ;;  %v422_v13 = vadd.f32 %v421_v12, %v378_v9  ;;  %v450_v14 = vpop.f32.mrf.mxu3 }
 0x140   : > { %v451_v15 = vadd.f32 %v450_v14, %v378_v9  ;;  %v418_v16 = vpop.f32.mrf.mxu0 }
 0x141   : > { %472 = vst [vmem:[%s862_s24 + $0x20] sm:$0xff] %v422_v13  ;;  %v419_v17 = vadd.f32 %v418_v16, %v373_v7  ;;  %v447_v18 = vpop.f32.mrf.mxu1 }
 0x142   : > { %473 = vst [vmem:[%s862_s24 + $0x28] sm:$0xff] %v451_v15  ;;  %v448_v19 = vadd.f32 %v447_v18, %v373_v7 }
 0x143   : > { %vm458_vm15 = vcmp.ge.f32.partialorder %v419_v17, 0.0  ;;  %v462_v20 = vmul.f32 0.01, %v419_v17 }
 0x144   : > { %vm459_vm0 = vcmp.ge.f32.partialorder %v448_v19, 0.0  ;;  %v463_v21 = vmul.f32 0.01, %v448_v19 }
 0x145   : > { %v466_v22 = vsel %vm458_vm15, %v419_v17, %v462_v20 }
 0x146   : > { %470 = vst [vmem:[%s862_s24 + $0x10] sm:$0xff] %v466_v22  ;;  %v467_v24 = vsel %vm459_vm0, %v448_v19, %v463_v21  ;;  %v424_v25 = vpop.f32.mrf.mxu2 }
 0x147   : > { %471 = vst [vmem:[%s862_s24 + $0x18] sm:$0xff] %v467_v24  ;;  %v425_v26 = vadd.f32 %v424_v25, %v383_v23  ;;  %v453_v27 = vpop.f32.mrf.mxu3 }
 0x148   : > { %v454_v28 = vadd.f32 %v453_v27, %v383_v23 }
 0x149   : > { %474 = vst [vmem:[%s862_s24 + $0x30] sm:$0xff] %v425_v26 }
 0x14a   : > { %475 = vst [vmem:[%s862_s24 + $0x38] sm:$0xff] %v454_v28 }
 0x14b PF: > { %s13_s14 = sadd.s32 1, %s689_s14   ;;  %s893_s12 = smov %s685_s13 }
 0x14c   : > { %p10_p5 = scmp.ge.s32.totalorder %s13_s14, 4   ;;  %s894_s13 = smov %s896_s15 }
 0x14e   :  { %12 = sbr.rel (!%p10_p5) target bundleno = 2 (0x2), region = 62 }

// kernel: res_block_up.5
= control target key start
LH: loop header
LB: loop body
LE: loop exit
PB: predicated region body
PF: predicated region fallthrough
CT: control target
= control target key end

     0   :  { %s613_s15 = smov 0   ;;  %s615_s16 = smov 0   ;;  %s680_s0 = inlined_call_operand.vmem [shape: f32[2,4,1024], index: 0, kind: input, shape index: {}]   ;;  %s681_s1 = inlined_call_operand.vmem [shape: f32[2,4,1], index: 1, kind: input, shape index: {}]   ;;  %s682_s2 = inlined_call_operand.vmem [shape: f32[4,4], index: 2, kind: input, shape index: {}]   ;;  %s683_s3 = inlined_call_operand.vmem [shape: f32[2,4,1024], index: 3, kind: input, shape index: {}]   ;;  %s684_s4 = inlined_call_operand.vmem [shape: f32[2,4,1024], index: 4, kind: output, shape index: {}]  }
   0x1   :  { %s617_s17 = smov 0   ;;  %s619_s18 = smov 0  }
   0x2   :  { %s621_s19 = smov 0  }
   0x3 LB: > { %s23_s20 = sadd.s32 1, %s576_s17  ;;  %s26_s21 = sadd.s32 1, %s580_s18  ;;  %s584_s19 = sphi %s621_s19, %s14_s19   ;;  %s580_s18 = sphi %s619_s18, %s688_s18   ;;  %s576_s17 = sphi %s617_s17, %s687_s17   ;;  %s572_s16 = sphi %s615_s16, %s686_s16   ;;  %s568_s15 = sphi %s613_s15, %s685_s15  }
   0x4   : > { %p24_p0 = scmp.ge.s32.totalorder %s23_s20, 2  ;;  %p483_p1 = scmp.ge.s32.totalorder %s584_s19, 1 }
   0x5   : > { %p209_p2 = scmp.lt.s32.totalorder %s584_s19, 5 }
   0x6   : > { %s690_s20 = smov (%p24_p0, %s23_s20), 0  ;;  %s692_s21 = smov (!%p24_p0, %s26_s21), %s580_s18 }
   0x7   : > { %p210_p3 = pnand %p483_p1, %p209_p2  ;;  %p28_p4 = scmp.ge.s32.totalorder %s692_s21, 2 }
   0x8   : > { %p257_p5 = scmp.lt.s32.totalorder (!%p210_p3), %s572_s16, 1  ;;  %s484_s28 = sshll.u32 (!%p210_p3), %s568_s15, 2 }
   0x9   : > { %s694_s21 = smov (%p28_p4, %s692_s21), 0  ;;  %213 = sbr.rel (%p210_p3) target bundleno = 298 (0x12a), region = 36 }
   0xa   : > { %p259_p6 = scmp.lt.s32.totalorder (!%p210_p3), %s484_s28, 7 }
   0xe   : > { %s696_s16 = smov (!%p257_p5, %s572_s16), 1  ;;  %vm297_vm0 = vcmask 1043456   ;;  %v290_v2 = vld [vmem:[%s682_s2] sm:$0xf]  ;;  %vm293_vm1 = vcmask 31744   ;;  %v586_v3 = vmov 0  }
   0xf   : > { %s487_s22 = sshll.u32 %s696_s16, 2  ;;  %541 = vset.pattern.permute.xlu0 %v586_v3  ;;  %s698_s28 = smov (!%p259_p6, %s484_s28), 7  ;;  %v587_v18 = vmov 839922192  }
  0x10   : > { %s269_s25 = scalar_lea.vmem %s681_s1, %s487_s22  ;;  %s485_s29 = sshll.u32 %s696_s16, 3  ;;  %v347_v19 = vunpack.c.l.s4 %v587_v18 }
  0x11   : > { %v291_v0 = vld [vmem:[%s269_s25] sm:$0xf]  ;;  %s262_s30 = sadd.s32 %s485_s29, %s698_s28 }
  0x12   : > { %v292_v1 = vmul.f32 0.0009765625, %v291_v0  ;;  %s486_s5 = sshll.u32 %s262_s30, 2  ;;  %v348_v20 = vunpack.c.0.s8 %v347_v19 }
  0x13   : > { %s264_s8 = scalar_lea.vmem %s680_s0, %s486_s5  ;;  %s278_s11 = scalar_lea.vmem %s683_s3, %s486_s5 }
  0x14   : > { %494 = vmatpush.msk.msra.mxu0 %vm297_vm0, %v292_v1  ;;  %v340_v22 = vld [vmem:[%s264_s8] sm:$0xff]  ;;  %v341_v23 = vld [vmem:[%s264_s8 + $0x8] sm:$0xff]  ;;  %s288_s14 = scalar_lea.vmem %s684_s4, %s486_s5 }
  0x15   : > { %495 = vmatmul.msk.f32.vlgmr.msra.gmra.mxu0 %vm293_vm1, %v290_v2  ;;  %v353_v25 = vld [vmem:[%s278_s11] sm:$0xff]  ;;  %v354_v26 = vld [vmem:[%s278_s11 + $0x8] sm:$0xff] }
  0x92   : > { %v318_v4 = vpop.f32.mrf.mxu0 }
  0x93   : > { %v496_v5 = vmul.f32 -1.442695, %v318_v4 }
  0x95   : > { %542 = vpow2.f32 %v496_v5 }
  0x9b   : > { %v543_v6 = vpop.eup %542 }
  0x9c   : > { %v324_v7 = vadd.f32 1.0, %v543_v6 }
  0x9e   : > { %544 = vrcp.f32 %v324_v7  ;;  %v336_v11 = vand.u32 2147483648, %v324_v7  ;;  %v334_v13 = vand.u32 2147483647, %v324_v7  ;;  %vm330_vm3 = vweird.f32 %v324_v7 }
  0xa0   : > { %v337_v15 = vor.u32 1.1754944e-38, %v336_v11  ;;  %vm335_vm5 = vcmp.eq.f32.partialorder %v334_v13, 8.507059e+37 }
  0xa4   : > { %v545_v8 = vpop.eup %544 }
  0xa5   : > { %v326_v9 = vmul.f32 %v545_v8, %v324_v7  ;;  %vm331_vm2 = vweird.f32 %v545_v8 }
  0xa6   : > { %vm332_vm4 = vmor %vm330_vm3, %vm331_vm2 }
  0xa7   : > { %v327_v10 = vsub.f32 1.0, %v326_v9 }
  0xa9   : > { %v328_v12 = vmul.f32 %v545_v8, %v327_v10 }
  0xab   : > { %v329_v14 = vadd.f32 %v545_v8, %v328_v12 }
  0xad   : > { %v333_v16 = vsel %vm332_vm4, %v545_v8, %v329_v14 }
  0xae   : > { %v338_v17 = vsel %vm335_vm5, %v337_v15, %v333_v16 }
  0xaf   : > { %344 = vperm.xlu0 %541, %v338_v17  }
 0x121   : > { %v345_v21 = vpop.permute.xlu0 %344 }
 0x122   : > { %v349_v24 = vperm.slane %v345_v21, %v348_v20 }
 0x124   : > { %v351_v27 = vmul.f32 %v349_v24, %v340_v22  ;;  %v352_v28 = vmul.f32 %v349_v24, %v341_v23 }
 0x126   : > { %v355_v29 = vadd.f32 %v353_v25, %v351_v27  ;;  %v356_v30 = vadd.f32 %v354_v26, %v352_v28 }
 0x128   : > { %357 = vst [vmem:[%s288_s14] sm:$0xff] %v355_v29 }
 0x129   : > { %358 = vst [vmem:[%s288_s14 + $0x8] sm:$0xff] %v356_v30 }
 0x12a PF: > { %s14_s19 = sadd.s32 1, %s584_s19   ;;  %s685_s15 = smov %s576_s17 }
 0x12b   : > { %p11_p7 = scmp.ge.s32.totalorder %s14_s19, 6   ;;  %s686_s16 = smov %s580_s18 }
 0x12c   : > { %s687_s17 = smov %s690_s20  ;;  %s688_s18 = smov %s694_s21 }
 0x12d   :  { %13 = sbr.rel (!%p11_p7) target bundleno = 3 (0x3), region = 72 }

// kernel: res_block_up.4
= control target key start
LH: loop header
LB: loop body
LE: loop exit
PB: predicated region body
PF: predicated region fallthrough
CT: control target
= control target key end

     0   :  { %s1219_s21 = smov 0   ;;  %s1221_s22 = smov 0   ;;  %s1565_s0 = inlined_call_operand.vmem [shape: f32[2,2,8,578], index: 0, kind: input, shape index: {}]   ;;  %s1566_s1 = inlined_call_operand.vmem [shape: f32[4,72], index: 1, kind: input, shape index: {}]   ;;  %s1567_s2 = inlined_call_operand.vmem [shape: f32[4,1], index: 2, kind: input, shape index: {}]   ;;  %s1568_s3 = inlined_call_operand.vmem [shape: f32[4,4], index: 3, kind: input, shape index: {}]   ;;  %s1569_s4 = inlined_call_operand.vmem [shape: f32[4,1], index: 4, kind: input, shape index: {}]   ;;  %s1570_s5 = inlined_call_operand.vmem [shape: f32[2,4,1024], index: 5, kind: output, shape index: {0}]   ;;  %s1571_s6 = inlined_call_operand.vmem [shape: f32[2,4,1], index: 6, kind: output, shape index: {1}]  }
   0x1   :  { %s1223_s23 = smov 0   ;;  %s1225_s24 = smov 0  }
   0x2   :  { %s1227_s25 = smov 0  }
   0x3 LB: > { %s26_s26 = sadd.s32 1, %s1164_s23  ;;  %s29_s27 = sadd.s32 1, %s1168_s24  ;;  %s1172_s25 = sphi %s1227_s25, %s17_s25   ;;  %s1168_s24 = sphi %s1225_s24, %s1579_s24   ;;  %s1164_s23 = sphi %s1223_s23, %s1578_s23   ;;  %s1160_s22 = sphi %s1221_s22, %s1577_s22   ;;  %s1156_s21 = sphi %s1219_s21, %s1576_s21  }
   0x4   : > { %p27_p0 = scmp.ge.s32.totalorder %s26_s26, 2  ;;  %p995_p1 = scmp.ge.s32.totalorder %s1172_s25, 1 }
   0x5   : > { %p235_p2 = scmp.lt.s32.totalorder %s1172_s25, 5 }
   0x6   : > { %s1581_s26 = smov (%p27_p0, %s26_s26), 0  ;;  %s1583_s27 = smov (!%p27_p0, %s29_s27), %s1168_s24 }
   0x7   : > { %p236_p3 = pnand %p995_p1, %p235_p2  ;;  %p31_p4 = scmp.ge.s32.totalorder %s1583_s27, 2 }
   0x8   : > { %p277_p5 = scmp.lt.s32.totalorder (!%p236_p3), %s1160_s22, 1  ;;  %p279_p6 = scmp.lt.s32.totalorder (!%p236_p3), %s1156_s21, 1 }
   0x9   : > { %s1585_s27 = smov (%p31_p4, %s1583_s27), 0  ;;  %239 = sbr.rel (%p236_p3) target bundleno = 652 (0x28c), region = 40 }
   0xa   : > { %s1174_s16 = smov (!%p236_p3), 62   ;;  %s1175_s17 = smov (!%p236_p3), 64  }
   0xb   : > { %s1176_s18 = smov (!%p236_p3), 63   ;;  %s1177_s19 = smov (!%p236_p3), 94  }
   0xc   : > { %s1178_s20 = smov (!%p236_p3), 95   ;;  %p1038_p8 = scmp.ne.s32.totalorder (!%p236_p3), %s1156_s21, 0 }
   0xe   : > { %s1587_s22 = smov (!%p277_p5, %s1160_s22), 1  ;;  %v300_v7 = vlaneseq  ;;  %vm501_vm8 = vcmask 506880   ;;  %vm562_vm11 = vcmask 515072   ;;  %vm478_vm12 = vcmask 523264  }
   0xf   : > { %s280_s28 = scalar_select %p279_p6, %s1156_s21, 1  ;;  %vm455_vm15 = vcmask 769024  }
  0x10   : > { %s1042_s29 = smul.u32 10, %s1587_s22  ;;  %s1000_s30 = sshll.u32 %s1587_s22, 2  ;;  %v301_v8 = vand.u32 127, %v300_v7 }
  0x11   : > { %s1041_s7 = smul.u32 5, %s280_s28  ;;  %s1260_s10 = scalar_lea.vmem %s1571_s6, %s1000_s30 }
  0x12   : > { %s1179_s28 = smov 96   ;;  %s1181_s30 = smov 127   ;;  %v303_v10 = vadd.s32 256, %v301_v8  ;;  %v304_v12 = vadd.s32 384, %v301_v8  ;;  %v302_v35 = vadd.s32 128, %v301_v8 }
  0x13   : > { %s283_s11 = sadd.s32 %s1042_s29, %s1041_s7  ;;  %s1180_s29 = smov 126  }
  0x14   : > { %s996_s12 = sshll.u32 %s283_s11, 3  ;;  %s1001_s7 = sshll.u32 %s1156_s21, 9 }
  0x15   : > { %s285_s15 = scalar_lea.vmem %s1565_s0, %s996_s12  ;;  %v306_v11 = vstv %s1001_s7 }
  0x16   : > { %v385_v0 = vld [vmem:[%s285_s15 + $0x20] sm:$0xff]  ;;  %v1265_v1 = vld [vmem:[%s285_s15 + $0x10] sm:$0xff]  ;;  %v1270_v2 = vld [vmem:[%s285_s15 + $0x18] sm:$0xff]  ;;  %v1308_v14 = vadd.s32 %v306_v11, %v303_v10  ;;  %v1310_v15 = vadd.s32 %v306_v11, %v304_v12  ;;  %v1336_v38 = vadd.s32 %v306_v11, %v301_v8  ;;  %v1340_v42 = vadd.s32 %v306_v11, %v302_v35 }
  0x17   : > { %499 = vrot.lane.b32.xlu1 %v385_v0, %s1174_s16  ;;  %472 = vrot.lane.b32.xlu2 %v1265_v1, %s1175_s17  ;;  %v1093_v3 = vpack.i.bf16 %v1270_v2, %v1265_v1  ;;  %v1277_v4 = vld [vmem:[%s285_s15] sm:$0xff]  ;;  %v1286_v6 = vld [vmem:[%s285_s15 + $0x8] sm:$0xff] }
  0x18   : > { %495 = vrot.lane.b32.xlu0 %v1265_v1, %s1174_s16  ;;  %v1098_v5 = vpack.i.bf16 %v1277_v4, %v385_v0  ;;  %v1118_v9 = vpack.i.bf16 %v1286_v6, %v1277_v4  ;;  %v328_v16 = vsub.s32 0, %v1308_v14  ;;  %vm327_vm0 = vcmp.lt.s32.totalorder %v1308_v14, 0 }
  0x19   : > { %v335_v17 = vsub.s32 0, %v1310_v15  ;;  %vm334_vm1 = vcmp.lt.s32.totalorder %v1310_v15, 0  ;;  %v314_v46 = vsub.s32 0, %v1336_v38  ;;  %vm313_vm14 = vcmp.lt.s32.totalorder %v1336_v38, 0 }
  0x1a   : > { %v329_v19 = vsel %vm327_vm0, %v328_v16, %v1308_v14  ;;  %v321_v49 = vsub.s32 0, %v1340_v42 }
  0x1b   : > { %v336_v20 = vsel %vm334_vm1, %v335_v17, %v1310_v15  ;;  %v331_v21 = vand.u32 31, %v329_v19  ;;  %v315_v53 = vsel %vm313_vm14, %v314_v46, %v1336_v38 }
  0x1c   : > { %v338_v22 = vand.u32 31, %v336_v20  ;;  %v317_v59 = vand.u32 31, %v315_v53 }
  0x1d   : > { %v332_v23 = vsub.s32 0, %v331_v21 }
  0x1e   : > { %v339_v25 = vsub.s32 0, %v338_v22  ;;  %v318_v62 = vsub.s32 0, %v317_v59 }
  0x1f   : > { %474 = vrot.lane.b32.xlu2 %v1270_v2, %s1175_s17  ;;  %1094 = vrot.lane.b32.xlu1 %v1093_v3, %s1176_s18  ;;  %v333_v26 = vsel %vm327_vm0, %v332_v23, %v331_v21  ;;  %vm543_vm0 = vcmask 777216  }
  0x20   : > { %497 = vrot.lane.b32.xlu0 %v1270_v2, %s1174_s16  ;;  %v340_v27 = vsel %vm334_vm1, %v339_v25, %v338_v22  ;;  %vm343_vm2 = vcmp.ne.s32.totalorder %v333_v26, 0  ;;  %vm347_vm3 = vcmp.lt.s32.totalorder %v333_v26, 0  ;;  %v355_v31 = vadd.s32 32, %v333_v26 }
  0x21   : > { %vm344_vm4 = vcmp.ne.s32.totalorder %v340_v27, 0  ;;  %vm348_vm5 = vcmp.lt.s32.totalorder %v340_v27, 0  ;;  %vm351_vm6 = vmand %vm347_vm3, %vm343_vm2  ;;  %v356_v32 = vadd.s32 32, %v340_v27  ;;  %vm320_vm1 = vcmp.lt.s32.totalorder %v1340_v42, 0 }
  0x22   : > { %vm352_vm7 = vmand %vm348_vm5, %vm344_vm4  ;;  %v1326_v33 = vsel %vm351_vm6, %v355_v31, %v333_v26  ;;  %v322_v57 = vsel %vm320_vm1, %v321_v49, %v1340_v42  ;;  %v319_v8 = vsel %vm313_vm14, %v318_v62, %v317_v59  ;;  %vm432_vm5 = vcmask 785408  }
  0x23   : > { %v1328_v34 = vsel %vm352_vm7, %v356_v32, %v340_v27  ;;  %vm1572_vm9 = vcmp.lt.s32.totalorder %v1326_v33, 31  ;;  %vm363_vm13 = vcmp.gt.s32.totalorder %v1326_v33, 0  ;;  %v324_v61 = vand.u32 31, %v322_v57 }
  0x24   : > { %vm1573_vm10 = vcmp.lt.s32.totalorder %v1328_v34, 31  ;;  %vm364_vm2 = vcmp.gt.s32.totalorder %v1328_v34, 0  ;;  %vm341_vm3 = vcmp.ne.s32.totalorder %v319_v8, 0  ;;  %vm345_vm4 = vcmp.lt.s32.totalorder %v319_v8, 0 }
  0x25   : > { %v353_v16 = vadd.s32 32, %v319_v8 }
  0x27   : > { %451 = vrot.lane.b32.xlu2 %v1270_v2, %s1177_s19  ;;  %449 = vrot.lane.b32.xlu1 %v1265_v1, %s1177_s19 }
  0x28   : > { %1099 = vrot.lane.b32.xlu0 %v1098_v5, %s1176_s18 }
  0x2f   : > { %1104 = vrot.lane.b32.xlu2 %v1093_v3, %s1178_s20  ;;  %453 = vrot.lane.b32.xlu1 %v385_v0, %s1177_s19 }
  0x30   : > { %476 = vrot.lane.b32.xlu0 %v385_v0, %s1175_s17 }
  0x37   : > { %428 = vrot.lane.b32.xlu1 %v1270_v2, %s1179_s28  ;;  %491 = vrot.lane.b32.xlu2 %v1277_v4, %s1174_s16 }
  0x38   : > { %426 = vrot.lane.b32.xlu0 %v1265_v1, %s1179_s28 }
  0x3f   : > { %1109 = vrot.lane.b32.xlu1 %v1098_v5, %s1178_s20  ;;  %403 = vrot.lane.b32.xlu2 %v1265_v1, %s1180_s29 }
  0x40   : > { %493 = vrot.lane.b32.xlu0 %v1286_v6, %s1174_s16 }
  0x47   : > { %430 = vrot.lane.b32.xlu1 %v385_v0, %s1179_s28  ;;  %554 = vrot.lane.b32.xlu2 %v1286_v6, %s1176_s18  ;;  %s998_s18 = sshll.u32 %s1587_s22, 3 }
  0x48   : > { %405 = vrot.lane.b32.xlu0 %v1270_v2, %s1180_s29 }
  0x4f   : > { %468 = vrot.lane.b32.xlu1 %v1277_v4, %s1175_s17  ;;  %470 = vrot.lane.b32.xlu2 %v1286_v6, %s1175_s17  ;;  %s997_s17 = sshll.u32 %s1156_s21, 2 }
  0x50   : > { %407 = vrot.lane.b32.xlu0 %v385_v0, %s1180_s29  ;;  %p289_p7 = scmp.lt.s32.totalorder %s997_s17, 7 }
  0x52   : > { %s1589_s17 = smov (!%p289_p7, %s997_s17), 7 }
  0x57   : > { %445 = vrot.lane.b32.xlu1 %v1277_v4, %s1177_s19  ;;  %447 = vrot.lane.b32.xlu2 %v1286_v6, %s1177_s19  ;;  %s292_s19 = sadd.s32 %s998_s18, %s1589_s17 }
  0x58   : > { %1114 = vrot.lane.b32.xlu0 %v1093_v3, %s1181_s30 }
  0x5f   : > { %535 = vrot.lane.b32.xlu1 %v1286_v6, %s1178_s20  ;;  %422 = vrot.lane.b32.xlu2 %v1277_v4, %s1179_s28  ;;  %s999_s20 = sshll.u32 %s292_s19, 2 }
  0x60   : > { %522 = vrot.lane.b32.xlu0 %v385_v0, %s1181_s30  ;;  %v325_v0 = vsub.s32 0, %v324_v61 }
  0x62   : > { %v326_v10 = vsel %vm320_vm1, %v325_v0, %v324_v61 }
  0x63   : > { %vm342_vm6 = vcmp.ne.s32.totalorder %v326_v10, 0  ;;  %vm346_vm7 = vcmp.lt.s32.totalorder %v326_v10, 0  ;;  %v354_v17 = vadd.s32 32, %v326_v10 }
  0x64   : > { %vm350_vm14 = vmand %vm346_vm7, %vm342_vm6  ;;  %vm524_vm6 = vcmask 1039360  }
  0x65   : > { %v1406_v21 = vsel %vm350_vm14, %v354_v17, %v326_v10  ;;  %vm832_vm14 = vcmp.lt.s32.totalorder %v1336_v38, 1024 }
  0x67   : > { %401 = vrot.lane.b32.xlu2 %v1286_v6, %s1180_s29  ;;  %399 = vrot.lane.b32.xlu1 %v1277_v4, %s1180_s29  ;;  %s294_s29 = scalar_lea.vmem %s1570_s5, %s999_s20 }
  0x68   : > { %424 = vrot.lane.b32.xlu0 %v1286_v6, %s1179_s28 }
  0x70   : > { %1119 = vrot.lane.b32.xlu0 %v1118_v9, %s1181_s30 }
  0x71   : > { %v1306_v13 = vpop.permute.xlu2 %472 }
  0x79   : > { %v1316_v18 = vpop.permute.xlu2 %474 }
  0x7a   : > { %v481_v50 = vsel %vm478_vm12, %v1306_v13, %v1316_v18 }
  0x81   : > { %v1320_v24 = vpop.permute.xlu2 %451 }
  0x89   : > { %v500_v28 = vpop.permute.xlu1 %499  ;;  %v1322_v29 = vpop.permute.xlu2 %1104 }
  0x8a   : > { %v1324_v30 = vpop.permute.xlu0 %495  ;;  %v1107_v47 = vunpack.i.h.bf16 %v1322_v29  ;;  %v1106_v48 = vunpack.i.l.bf16 %v1322_v29 }
  0x8c   : > { %v546_v56 = vsel %vm543_vm0, %v1106_v48, %v1107_v47 }
  0x91   : > { %v1330_v36 = vpop.permute.xlu1 %1094  ;;  %v1332_v37 = vpop.permute.xlu2 %491 }
  0x92   : > { %v1097_v39 = vunpack.i.h.bf16 %v1330_v36  ;;  %v1096_v40 = vunpack.i.l.bf16 %v1330_v36  ;;  %v498_v41 = vpop.permute.xlu0 %497 }
  0x93   : > { %v504_v43 = vsel %vm501_vm8, %v1324_v30, %v498_v41  ;;  %v505_v44 = vsel %vm501_vm8, %v498_v41, %v500_v28 }
  0x94   : > { %1016 = vmatpush.msk.msra.mxu2 %vm1572_vm9, %v504_v43  ;;  %1023 = vmatpush.msk.msra.mxu3 %vm1573_vm10, %v505_v44  ;;  %v565_v45 = vsel %vm562_vm11, %v1096_v40, %v1097_v39  ;;  %v1182_v43 = vmov 0  }
  0x95   : > { %1123 = vset.pattern.permute.xlu1 %v1182_v43  ;;  %1124 = vset.pattern.permute.xlu2 %v1182_v43 }
  0x96   : > { %628 = vmatpush.msra.mxu2 %v565_v45  ;;  %1125 = vset.pattern.permute.xlu0 %v1182_v43 }
  0x98   : > { %1017 = vmatpush.msk.msra.mxu2 %vm363_vm13, %v481_v50 }
  0x99   : > { %v1364_v51 = vpop.permute.xlu1 %449  ;;  %v1366_v52 = vpop.permute.xlu2 %403 }
  0x9a   : > { %v1100_v54 = vpop.permute.xlu0 %1099  ;;  %v458_v55 = vsel %vm455_vm15, %v1364_v51, %v1320_v24 }
  0x9b   : > { %v1101_v58 = vunpack.i.l.bf16 %v1100_v54  ;;  %1018 = vmatpush.msk.msra.mxu2 %vm1572_vm9, %v458_v55  ;;  %vm349_vm9 = vmand %vm345_vm4, %vm341_vm3  ;;  %v1102_v25 = vunpack.i.h.bf16 %v1100_v54  ;;  %vm1575_vm4 = vcmp.lt.s32.totalorder %v1328_v34, 31 }
  0x9c   : > { %v1404_v20 = vsel %vm349_vm9, %v353_v16, %v319_v8  ;;  %vm362_vm9 = vcmp.gt.s32.totalorder %v1406_v21, 0 }
  0x9d   : > { %v566_v60 = vsel %vm562_vm11, %v1097_v39, %v1101_v58  ;;  %631 = vmatpush.msra.mxu2 %v546_v56  ;;  %vm365_vm1 = vcmp.lt.s32.totalorder %v1404_v20, 31  ;;  %vm361_vm3 = vcmp.gt.s32.totalorder %v1404_v20, 0  ;;  %v311_v56 = vld [vmem:[%s1566_s1] sm:$0xf] }
  0x9e   : > { %648 = vmatpush.msra.mxu3 %v566_v60 }
  0xa1   : > { %v454_v63 = vpop.permute.xlu1 %453  ;;  %v555_v3 = vpop.permute.xlu2 %554 }
  0xa2   : > { %v477_v5 = vpop.permute.xlu0 %476  ;;  %v459_v9 = vsel %vm455_vm15, %v1320_v24, %v454_v63  ;;  %v563_v31 = vsel %vm562_vm11, %v1102_v25, %v555_v3  ;;  %v564_v32 = vsel %vm562_vm11, %v555_v3, %v1096_v40  ;;  %vm1574_vm11 = vcmp.lt.s32.totalorder %v1326_v33, 31 }
  0xa3   : > { %v482_v7 = vsel %vm478_vm12, %v1316_v18, %v477_v5 }
  0xa4   : > { %1024 = vmatpush.msk.msra.mxu3 %vm364_vm2, %v482_v7 }
  0xa6   : > { %1025 = vmatpush.msk.msra.mxu3 %vm1573_vm10, %v459_v9  ;;  %vm366_vm10 = vcmp.lt.s32.totalorder %v1406_v21, 31 }
  0xa9   : > { %v429_v11 = vpop.permute.xlu1 %428  ;;  %v471_v19 = vpop.permute.xlu2 %470 }
  0xaa   : > { %v1398_v12 = vpop.permute.xlu0 %426  ;;  %v480_v35 = vsel %vm478_vm12, %v471_v19, %v1306_v13  ;;  %v312_v13 = vld [vmem:[%s1567_s2] sm:$0xf] }
  0xab   : > { %v435_v18 = vsel %vm432_vm5, %v1398_v12, %v429_v11  ;;  %573 = vperm.xlu1 %1123, %v312_v13  }
  0xac   : > { %1019 = vmatpush.msk.msra.mxu2 %vm363_vm13, %v435_v18 }
  0xb1   : > { %v1110_v22 = vpop.permute.xlu1 %1109 }
  0xb2   : > { %v1111_v23 = vunpack.i.l.bf16 %v1110_v22  ;;  %v494_v24 = vpop.permute.xlu0 %493  ;;  %v1112_v57 = vunpack.i.h.bf16 %v1110_v22 }
  0xb3   : > { %v502_v26 = vsel %vm501_vm8, %v1332_v37, %v494_v24  ;;  %v503_v27 = vsel %vm501_vm8, %v494_v24, %v1324_v30  ;;  %v448_v30 = vpop.permute.xlu2 %447  ;;  %vm409_vm8 = vcmask 1031168  }
  0xb4   : > { %1002 = vmatpush.msk.msra.mxu0 %vm365_vm1, %v502_v26  ;;  %1009 = vmatpush.msk.msra.mxu1 %vm366_vm10, %v503_v27  ;;  %v547_v28 = vsel %vm543_vm0, %v1107_v47, %v1111_v23  ;;  %v457_v39 = vsel %vm455_vm15, %v448_v30, %v1364_v51 }
  0xb5   : > { %651 = vmatpush.msra.mxu3 %v547_v28 }
  0xb6   : > { %588 = vmatpush.msra.mxu0 %v563_v31  ;;  %608 = vmatpush.msra.mxu1 %v564_v32 }
  0xb8   : > { %1010 = vmatpush.msk.msra.mxu1 %vm362_vm9, %v480_v35 }
  0xb9   : > { %v431_v37 = vpop.permute.xlu1 %430 }
  0xba   : > { %1011 = vmatpush.msk.msra.mxu1 %vm366_vm10, %v457_v39  ;;  %v406_v36 = vpop.permute.xlu0 %405  ;;  %v436_v40 = vsel %vm432_vm5, %v429_v11, %v431_v37 }
  0xbb   : > { %v412_v41 = vsel %vm409_vm8, %v1366_v52, %v406_v36  ;;  %1026 = vmatpush.msk.msra.mxu3 %vm364_vm2, %v436_v40  ;;  %v423_v58 = vpop.permute.xlu2 %422 }
  0xbc   : > { %1020 = vmatpush.msk.msra.mxu2 %vm1574_vm11, %v412_v41  ;;  %vm833_vm11 = vcmp.lt.s32.totalorder %v1340_v42, 1024 }
  0xc1   : > { %v469_v44 = vpop.permute.xlu1 %468 }
  0xc2   : > { %v408_v45 = vpop.permute.xlu0 %407  ;;  %v479_v46 = vsel %vm478_vm12, %v469_v44, %v471_v19  ;;  %vm576_vm12 = vcmask 588800  }
  0xc3   : > { %v413_v47 = vsel %vm409_vm8, %v406_v36, %v408_v45  ;;  %1003 = vmatpush.msk.msra.mxu0 %vm361_vm3, %v479_v46  ;;  %v402_v33 = vpop.permute.xlu2 %401 }
  0xc4   : > { %1027 = vmatpush.msk.msra.mxu3 %vm1575_vm4, %v413_v47  ;;  %vm835_vm4 = vcmp.lt.s32.totalorder %v1310_v15, 1024 }
  0xc9   : > { %v446_v49 = vpop.permute.xlu1 %445 }
  0xca   : > { %v1115_v50 = vpop.permute.xlu0 %1114  ;;  %v456_v51 = vsel %vm455_vm15, %v446_v49, %v448_v30 }
  0xcb   : > { %v1117_v53 = vunpack.i.h.bf16 %v1115_v50  ;;  %v1116_v54 = vunpack.i.l.bf16 %v1115_v50  ;;  %1004 = vmatpush.msk.msra.mxu0 %vm365_vm1, %v456_v51 }
  0xcd   : > { %v527_v55 = vsel %vm524_vm6, %v1116_v54, %v1117_v53 }
  0xce   : > { %634 = vmatpush.msra.mxu2 %v527_v55 }
  0xd0   : > { %1021 = vmatpush.msk.msra.mxu2 %vm363_vm13, %v1265_v1  ;;  %vm671_vm13 = vcmask 31744  }
  0xd1   : > { %1022 = vmatmul.msk.f32.vlgmr.msra.gmra.mxu2 %vm576_vm12, %v311_v56  ;;  %v536_v59 = vpop.permute.xlu1 %535 }
  0xd2   : > { %v523_v60 = vpop.permute.xlu0 %522  ;;  %v544_v61 = vsel %vm543_vm0, %v1112_v57, %v536_v59  ;;  %v545_v62 = vsel %vm543_vm0, %v536_v59, %v1106_v48 }
  0xd3   : > { %591 = vmatpush.msra.mxu0 %v544_v61  ;;  %611 = vmatpush.msra.mxu1 %v545_v62  ;;  %v528_v63 = vsel %vm524_vm6, %v1117_v53, %v523_v60 }
  0xd4   : > { %654 = vmatpush.msra.mxu3 %v528_v63 }
  0xd6   : > { %1028 = vmatpush.msk.msra.mxu3 %vm364_vm2, %v1270_v2  ;;  %v411_v2 = vsel %vm409_vm8, %v402_v33, %v1366_v52  ;;  %v665_v52 = vld [vmem:[%s1569_s4] sm:$0xf] }
  0xd7   : > { %1029 = vmatmul.msk.f32.vlgmr.msra.gmra.mxu3 %vm576_vm12, %v311_v56  ;;  %668 = vperm.xlu2 %1124, %v665_v52  }
  0xd9   : > { %v400_v1 = vpop.permute.xlu1 %399 }
  0xda   : > { %v425_v0 = vpop.permute.xlu0 %424  ;;  %v410_v48 = vsel %vm409_vm8, %v400_v1, %v402_v33 }
  0xdb   : > { %v433_v3 = vsel %vm432_vm5, %v423_v58, %v425_v0  ;;  %v434_v29 = vsel %vm432_vm5, %v425_v0, %v1398_v12 }
  0xdc   : > { %1005 = vmatpush.msk.msra.mxu0 %vm361_vm3, %v433_v3  ;;  %1012 = vmatpush.msk.msra.mxu1 %vm362_vm9, %v434_v29 }
  0xde   : > { %1013 = vmatpush.msk.msra.mxu1 %vm366_vm10, %v411_v2  ;;  %1006 = vmatpush.msk.msra.mxu0 %vm365_vm1, %v410_v48  ;;  %vm675_vm10 = vcmask 1043456  }
  0xe2   : > { %v1120_v34 = vpop.permute.xlu0 %1119 }
  0xe3   : > { %v1122_v5 = vunpack.i.h.bf16 %v1120_v34  ;;  %v1121_v7 = vunpack.i.l.bf16 %v1120_v34 }
  0xe5   : > { %v525_v8 = vsel %vm524_vm6, %v1121_v7, %v1122_v5  ;;  %v526_v9 = vsel %vm524_vm6, %v1122_v5, %v1116_v54 }
  0xe6   : > { %594 = vmatpush.msra.mxu0 %v525_v8  ;;  %614 = vmatpush.msra.mxu1 %v526_v9 }
  0xe8   : > { %1007 = vmatpush.msk.msra.mxu0 %vm361_vm3, %v1277_v4  ;;  %1014 = vmatpush.msk.msra.mxu1 %vm362_vm9, %v1286_v6  ;;  %v660_v6 = vld [vmem:[%s1568_s3] sm:$0xf]  ;;  %vm834_vm3 = vcmp.lt.s32.totalorder %v1308_v14, 1024 }
  0xe9   : > { %1008 = vmatmul.msk.f32.vlgmr.msra.gmra.mxu0 %vm576_vm12, %v311_v56  ;;  %1015 = vmatmul.msk.f32.vlgmr.msra.gmra.mxu1 %vm576_vm12, %v311_v56 }
 0x11d   : > { %v574_v10 = vpop.permute.xlu1 %573 }
 0x131   : > { %v669_v25 = vpop.permute.xlu2 %668 }
 0x154   : > { %v637_v11 = vpop.f32.mrf.mxu2 }
 0x155   : > { %v1498_v12 = vadd.f32 %v637_v11, %v574_v10 }
 0x157   : > { %v663_v4 = vmul.f32 %v1498_v12, %v1498_v12 }
 0x159   : > { %1034 = vmatpush.msk.msrb.mxu2 %vm675_vm10, %v663_v4 }
 0x15a   : > { %v657_v16 = vpop.f32.mrf.mxu3  ;;  %1035 = vmatmul.msk.f32.vlgmr.msrb.gmra.mxu2 %vm671_vm13, %v660_v6 }
 0x15b   : > { %v1507_v17 = vadd.f32 %v657_v16, %v574_v10 }
 0x15d   : > { %v664_v18 = vmul.f32 %v1507_v17, %v1507_v17 }
 0x15f   : > { %1036 = vmatpush.msk.msrb.mxu3 %vm675_vm10, %v664_v18 }
 0x160   : > { %1037 = vmatmul.msk.f32.vlgmr.msrb.gmra.mxu3 %vm671_vm13, %v660_v6 }
 0x166   : > { %v597_v19 = vpop.f32.mrf.mxu0  ;;  %v617_v20 = vpop.f32.mrf.mxu1 }
 0x167   : > { %v1513_v21 = vadd.f32 %v597_v19, %v574_v10  ;;  %v1515_v22 = vadd.f32 %v617_v20, %v574_v10 }
 0x169   : > { %v661_v23 = vmul.f32 %v1513_v21, %v1513_v21  ;;  %v662_v24 = vmul.f32 %v1515_v22, %v1515_v22 }
 0x16b   : > { %1030 = vmatpush.msk.msrb.mxu0 %vm675_vm10, %v661_v23  ;;  %1032 = vmatpush.msk.msrb.mxu1 %vm675_vm10, %v662_v24 }
 0x16c   : > { %1031 = vmatmul.msk.f32.vlgmr.msrb.gmra.mxu0 %vm671_vm13, %v660_v6  ;;  %1033 = vmatmul.msk.f32.vlgmr.msrb.gmra.mxu1 %vm671_vm13, %v660_v6 }
 0x1dd   : > { %v745_v26 = vpop.f32.mrf.mxu2 }
 0x1de   : > { %v746_v27 = vadd.f32 %v745_v26, %v669_v25 }
 0x1e0   : > { %1126 = vrsqrt.f32 %v746_v27  ;;  %vm799_vm15 = vcmp.eq.f32.partialorder %v746_v27, inf  ;;  %v802_v1 = vand.u32 2147483648, %v746_v27  ;;  %vm801_vm2 = vcmp.eq.f32.partialorder %v746_v27, 0.0 }
 0x1e3   : > { %v765_v28 = vpop.f32.mrf.mxu3 }
 0x1e4   : > { %v766_v31 = vadd.f32 %v765_v28, %v669_v25 }
 0x1e6   : > { %v1127_v32 = vpop.eup %1126  ;;  %1128 = vrsqrt.f32 %v766_v31  ;;  %vm811_vm0 = vcmp.eq.f32.partialorder %v766_v31, inf  ;;  %v814_v33 = vand.u32 2147483648, %v766_v31  ;;  %vm813_vm5 = vcmp.eq.f32.partialorder %v766_v31, 0.0 }
 0x1e7   : > { %v793_v30 = vmul.f32 %v1127_v32, %v746_v27 }
 0x1e9   : > { %v705_v35 = vpop.f32.mrf.mxu0  ;;  %v725_v37 = vpop.f32.mrf.mxu1  ;;  %v794_v39 = vmul.f32 %v1127_v32, %v793_v30 }
 0x1ea   : > { %v706_v36 = vadd.f32 %v705_v35, %v669_v25  ;;  %v726_v40 = vadd.f32 %v725_v37, %v669_v25 }
 0x1eb   : > { %v795_v41 = vmul.f32 0.5, %v794_v39 }
 0x1ec   : > { %v1129_v13 = vpop.eup %1128  ;;  %1130 = vrsqrt.f32 %v706_v36  ;;  %vm775_vm7 = vcmp.eq.f32.partialorder %v706_v36, inf  ;;  %v778_v8 = vand.u32 2147483648, %v706_v36  ;;  %vm777_vm1 = vcmp.eq.f32.partialorder %v706_v36, 0.0 }
 0x1ed   : > { %1132 = vrsqrt.f32 %v726_v40  ;;  %v796_v43 = vsub.f32 1.5, %v795_v41  ;;  %v805_v44 = vmul.f32 %v1129_v13, %v766_v31  ;;  %vm787_vm9 = vcmp.eq.f32.partialorder %v726_v40, inf }
 0x1ee   : > { %v790_v4 = vand.u32 2147483648, %v726_v40  ;;  %vm789_vm8 = vcmp.eq.f32.partialorder %v726_v40, 0.0 }
 0x1ef   : > { %v797_v45 = vmul.f32 %v1127_v32, %v796_v43  ;;  %v806_v46 = vmul.f32 %v1129_v13, %v805_v44 }
 0x1f1   : > { %v807_v49 = vmul.f32 0.5, %v806_v46  ;;  %v798_v54 = vmul.f32 %v797_v45, %v746_v27 }
 0x1f2   : > { %v1131_v47 = vpop.eup %1130 }
 0x1f3   : > { %v1133_v50 = vpop.eup %1132  ;;  %v769_v51 = vmul.f32 %v1131_v47, %v706_v36  ;;  %v808_v55 = vsub.f32 1.5, %v807_v49  ;;  %v800_v61 = vsel %vm799_vm15, %v746_v27, %v798_v54 }
 0x1f4   : > { %v781_v53 = vmul.f32 %v1133_v50, %v726_v40  ;;  %v803_v48 = vsel %vm801_vm2, %v802_v1, %v800_v61 }
 0x1f5   : > { %v770_v56 = vmul.f32 %v1131_v47, %v769_v51  ;;  %v809_v58 = vmul.f32 %v1129_v13, %v808_v55  ;;  %v818_v52 = vmul.f32 %v803_v48, %v1498_v12 }
 0x1f6   : > { %v782_v57 = vmul.f32 %v1133_v50, %v781_v53 }
 0x1f7   : > { %v771_v59 = vmul.f32 0.5, %v770_v56  ;;  %v810_v62 = vmul.f32 %v809_v58, %v766_v31  ;;  %v846_v25 = vsel %vm834_vm3, %v818_v52, 0.0 }
 0x1f8   : > { %v783_v60 = vmul.f32 0.5, %v782_v57  ;;  %v851_v14 = vsel %vm675_vm10, %v846_v25, 0.0 }
 0x1f9   : > { %v772_v63 = vsub.f32 1.5, %v771_v59  ;;  %v812_v3 = vsel %vm811_vm0, %v766_v31, %v810_v62 }
 0x1fa   : > { %v784_v0 = vsub.f32 1.5, %v783_v60  ;;  %v815_v2 = vsel %vm813_vm5, %v814_v33, %v812_v3 }
 0x1fb   : > { %v773_v29 = vmul.f32 %v1131_v47, %v772_v63  ;;  %v819_v5 = vmul.f32 %v815_v2, %v1507_v17 }
 0x1fc   : > { %v785_v34 = vmul.f32 %v1133_v50, %v784_v0 }
 0x1fd   : > { %v774_v7 = vmul.f32 %v773_v29, %v706_v36  ;;  %v825_v10 = vrot.slane %v819_v5, 4  ;;  %v847_v42 = vsel %vm835_vm4, %v819_v5, 0.0 }
 0x1fe   : > { %v786_v9 = vmul.f32 %v785_v34, %v726_v40  ;;  %v853_v15 = vsel %vm675_vm10, %v847_v42, 0.0 }
 0x1ff   : > { %v776_v11 = vsel %vm775_vm7, %v706_v36, %v774_v7  ;;  %v827_v17 = vsel %vm675_vm10, %v818_v52, %v825_v10 }
 0x200   : > { %v779_v6 = vsel %vm777_vm1, %v778_v8, %v776_v11  ;;  %v788_v16 = vsel %vm787_vm9, %v726_v40, %v786_v9  ;;  %831 = vst [vmem:[%s294_s29 + $0x8] sm:$0xff] %v827_v17 }
 0x201   : > { %v791_v18 = vsel %vm789_vm8, %v790_v4, %v788_v16  ;;  %v816_v19 = vmul.f32 %v779_v6, %v1513_v21 }
 0x202   : > { %v817_v12 = vmul.f32 %v791_v18, %v1515_v22 }
 0x203   : > { %v844_v20 = vsel %vm832_vm14, %v816_v19, 0.0 }
 0x204   : > { %v824_v23 = vrot.slane %v817_v12, 4  ;;  %v845_v24 = vsel %vm833_vm11, %v817_v12, 0.0  ;;  %v848_v26 = vsel %vm675_vm10, %v844_v20, 0.0 }
 0x205   : > { %v849_v27 = vsel %vm675_vm10, %v845_v24, 0.0 }
 0x206   : > { %v826_v21 = vsel %vm675_vm10, %v816_v19, %v824_v23  ;;  %v850_v28 = vadd.f32 %v849_v27, %v848_v26 }
 0x207   : > { %830 = vst [vmem:[%s294_s29] sm:$0xff] %v826_v21 }
 0x208   : > { %v852_v22 = vadd.f32 %v851_v14, %v850_v28 }
 0x20a   : > { %v854_v31 = vadd.f32 %v853_v15, %v852_v22 }
 0x20c   : > { %855 = vadd.xlane.f32.xlu0 %v854_v31 }
 0x27b   : > { %860 = sbr.rel (%p1038_p8) target bundleno = 642 (0x282), region = 44 }
 0x27f   : > { %v856_v38 = vpop.xlane.xlu0 %855 }
 0x280   : > { %vm861_vm6 = vcmask 3072   ;;  %v1183_v32 = vmov 0.0  }
 0x281   : > { %862 = vst.msk [vmem:[%s1260_s10] sm:$0xf] %vm861_vm6, %v1183_v32 }
 0x282 PF: > { %vm865_vm12 = vcmask 3072  }
 0x288   : > { %v863_v30 = vld [vmem:[%s1260_s10] sm:$0xf] }
 0x289   : > { %v864_v35 = vadd.f32 %v863_v30, %v856_v38 }
 0x28b   : > { %866 = vst.msk [vmem:[%s1260_s10] sm:$0xf] %vm865_vm12, %v864_v35 }
 0x28c PF: > { %s17_s25 = sadd.s32 1, %s1172_s25   ;;  %s1576_s21 = smov %s1164_s23 }
 0x28d   : > { %p14_p9 = scmp.ge.s32.totalorder %s17_s25, 6   ;;  %s1577_s22 = smov %s1168_s24 }
 0x28e   : > { %s1578_s23 = smov %s1581_s26  ;;  %s1579_s24 = smov %s1585_s27 }
 0x28f   :  { %16 = sbr.rel (!%p14_p9) target bundleno = 3 (0x3), region = 86 }

</bundles_post_ra>
